<compile_context>
chip_gen: v6e
topology: v6e:2x2x1
jax: 0.10.0
libtpu: 0.0.40
codegen_flags: <defaults>
</compile_context>

<pallas_src>
import functools

import jax
import jax.numpy as jnp
import numpy as np
from jax import lax
from jax.experimental import pallas as pl
from jax.experimental.pallas import tpu as pltpu


# ---------------------------------------------------------------------------
# Kernel
# ---------------------------------------------------------------------------
def _conv_ln_kernel(x_ref, res_ref, w_ref, p_ref, o_ref, *scratch,
                    eps, groups, cig, cog):
    """Fused grouped 1x1 conv + (eval-mode) dropout + residual + LayerNorm.

    NCW-native:
      x_ref:   (1, cin,  TW)           hidden_states tile (C on sublanes,
                                       W on lanes -> lane-dense for TW>=128)
      res_ref: (1, cout, TW)           residual (input_tensor) tile
      w_ref:   (groups, cog, cig)      per-group conv weights  (grid-invariant)
      p_ref:   (cout, 3) f32           packed [bias, gamma, beta] (grid-invariant)
      o_ref:   (1, cout, TW)
      scratch: optionally one (cout, TW) f32 VMEM accumulator (groups > 1).
    """
    params = p_ref[...]                          # (cout, 3) f32, VMEM-resident
    bias = params[:, 0:1]                        # (cout, 1)
    gamma = params[:, 1:2]
    beta = params[:, 2:3]

    x = x_ref[0]                                 # (cin,  TW) streamed dtype
    res = res_ref[0]                             # (cout, TW) streamed dtype

    if groups == 1:
        # Single MXU matmul, f32 accumulation; bias + residual fused in regs.
        y = jnp.dot(w_ref[0], x, preferred_element_type=jnp.float32)
        y = y + bias + res.astype(jnp.float32)
    else:
        # Per-group MXU matmuls written straight into the f32 VMEM scratch;
        # bias + residual fused per group while the group result is live.
        acc_ref = scratch[0]                     # (cout, TW) f32
        for g in range(groups):                  # static -> unrolled at trace
            xg = x[g * cig:(g + 1) * cig, :]     # (cig, TW)
            yg = jnp.dot(w_ref[g], xg,
                         preferred_element_type=jnp.float32)      # (cog, TW)
            yg = yg + bias[g * cog:(g + 1) * cog, :]
            yg = yg + res[g * cog:(g + 1) * cog, :].astype(jnp.float32)
            acc_ref[g * cog:(g + 1) * cog, :] = yg
        y = acc_ref[...]                         # (cout, TW) f32

    # TODO(synk): dropout is identity here (eval mode); training-mode
    # stochastic dropout (pltpu.prng_*) is not implemented.

    # LayerNorm over the channel axis (axis 0), biased variance like torch.
    # All stats in f32; rsqrt goes to the EUP slot (no division).
    mean = jnp.mean(y, axis=0, keepdims=True)                    # (1, TW)
    centered = y - mean
    var = jnp.mean(centered * centered, axis=0, keepdims=True)
    yn = centered * lax.rsqrt(var + eps)
    o_ref[0] = (yn * gamma + beta).astype(o_ref.dtype)


# ---------------------------------------------------------------------------
# Tile / VMEM planning
# ---------------------------------------------------------------------------
def _physical_vmem_bytes():
    try:
        info = pltpu.get_tpu_info()
        return int(getattr(info, "vmem_capacity_bytes", 64 << 20))
    except Exception:
        return 64 << 20   # conservative default (v7x-sized)


def _choose_w_tile(w_len, n_batch, cin, cout, act_itemsize, w_bytes,
                   use_scratch, vmem_budget, min_steps, max_tw):
    """Pick the largest lane-dense W tile (multiple of 128 dividing W, or the
    full W when W is not 128-aligned) whose per-step working set fits the
    budget, preferring tiles that keep at least `min_steps` grid steps."""
    pad8 = lambda c: ((c + 7) // 8) * 8

    def per_step_bytes(tw):
        b = 2 * tw * cin * act_itemsize            # x tile, double-buffered
        b += 2 * tw * cout * act_itemsize          # residual tile
        b += 2 * tw * cout * act_itemsize          # output tile
        if use_scratch:
            b += tw * cout * 4                     # per-group f32 accumulator
        b += 3 * tw * cout * 4                     # f32 live intermediates
        b += 2 * w_bytes                           # resident weights (x2, safe)
        b += 2 * pad8(cout) * 128 * 4              # packed params, lane-padded
        return b

    if w_len % 128 != 0:
        return w_len, per_step_bytes(w_len)        # full-dim block (tiling rule)

    fitting = [tw for tw in range(128, min(max_tw, w_len) + 1, 128)
               if w_len % tw == 0 and per_step_bytes(tw) <= vmem_budget]
    if not fitting:
        fitting = [128]
    stepped = [tw for tw in fitting if n_batch * (w_len // tw) >= min_steps]
    tw = max(stepped) if stepped else max(fitting)
    return tw, per_step_bytes(tw)


# ---------------------------------------------------------------------------
# Wrapper
# ---------------------------------------------------------------------------
def conv_dropout_layernorm(hidden_states_ncw, input_tensor_ncw,
                           conv_weight, conv_bias, ln_gamma, ln_beta,
                           *, groups, eps=1e-12):
    """hidden_states_ncw: (N, cin, W); input_tensor_ncw: (N, cout, W).
    conv_weight: (cout, cin // groups, 1); conv_bias / ln_gamma / ln_beta: (cout,).
    Returns (N, cout, W) in hidden_states' dtype -- identical NCW semantics to
    the PyTorch ConvDropoutLayerNorm module in eval mode."""
    n, cin, w_len = hidden_states_ncw.shape
    cout = input_tensor_ncw.shape[1]
    cig = cin // groups
    cog = cout // groups
    act_dtype = hidden_states_ncw.dtype

    # Per-group weights when the per-group channel counts are sublane-aligned;
    # otherwise fall back to the exact dense block-diagonal single matmul.
    if cig % 8 == 0 and cog % 8 == 0:
        groups_eff, cig_eff, cog_eff = groups, cig, cog
        w_packed = conv_weight[..., 0].reshape(groups, cog, cig)
    else:
        groups_eff, cig_eff, cog_eff = 1, cin, cout
        wk = conv_weight[..., 0]                               # (cout, cig)
        w_dense = jnp.zeros((cout, cin), dtype=conv_weight.dtype)
        for g in range(groups):
            w_dense = w_dense.at[g * cog:(g + 1) * cog,
                                 g * cig:(g + 1) * cig].set(
                                     wk[g * cog:(g + 1) * cog])
        w_packed = w_dense.reshape(1, cout, cin)

    # Weights travel in the activation dtype (bf16 weights when streaming bf16).
    # TODO(synk): on v5e one could force bf16 matmul operands even for f32
    # activations (3-4x fewer vmatmul pushes) at a small accuracy cost.
    w_packed = w_packed.astype(act_dtype)
    w_bytes = int(np.prod(w_packed.shape)) * jnp.dtype(w_packed.dtype).itemsize

    # Pack bias / gamma / beta into ONE grid-invariant (cout, 3) f32 buffer.
    params = jnp.stack([conv_bias.astype(jnp.float32),
                        ln_gamma.astype(jnp.float32),
                        ln_beta.astype(jnp.float32)], axis=1)   # (cout, 3)

    # Generation-aware VMEM planning.
    phys = _physical_vmem_bytes()
    if phys >= (100 << 20):            # v5e / v6e: 128 MiB physical VMEM
        budget, min_steps, max_tw, cap = (88 << 20), 2, 4096, (100 << 20)
    else:                              # v7x (64 MiB per TC) or unknown
        budget, min_steps, max_tw, cap = (28 << 20), 8, 1024, (48 << 20)

    act_itemsize = jnp.dtype(act_dtype).itemsize
    tw, per_step = _choose_w_tile(w_len, n, cin, cout, act_itemsize, w_bytes,
                                  use_scratch=(groups_eff > 1),
                                  vmem_budget=budget, min_steps=min_steps,
                                  max_tw=max_tw)
    vmem_limit = int(min(cap, max(per_step + (4 << 20), 32 << 20)))

    kernel = functools.partial(_conv_ln_kernel, eps=float(eps),
                               groups=groups_eff, cig=cig_eff, cog=cog_eff)
    scratch_shapes = ([pltpu.VMEM((cout, tw), jnp.float32)]
                      if groups_eff > 1 else [])

    out = pl.pallas_call(
        kernel,
        out_shape=jax.ShapeDtypeStruct((n, cout, w_len), act_dtype),
        grid_spec=pltpu.PrefetchScalarGridSpec(
            num_scalar_prefetch=0,
            grid=(n, w_len // tw),
            in_specs=[
                pl.BlockSpec((1, cin, tw), lambda b, wi: (b, 0, wi)),
                pl.BlockSpec((1, cout, tw), lambda b, wi: (b, 0, wi)),
                # Constant block indices: DMA'd once, VMEM-resident.
                pl.BlockSpec((groups_eff, cog_eff, cig_eff),
                             lambda b, wi: (0, 0, 0)),
                pl.BlockSpec((cout, 3), lambda b, wi: (0, 0)),
            ],
            out_specs=pl.BlockSpec((1, cout, tw), lambda b, wi: (b, 0, wi)),
            scratch_shapes=scratch_shapes,
        ),
        compiler_params=pltpu.CompilerParams(
            dimension_semantics=("parallel", "parallel"),
            vmem_limit_bytes=vmem_limit,
        ),
    )(hidden_states_ncw, input_tensor_ncw, w_packed, params)
    return out


# ---------------------------------------------------------------------------
# Pure-JAX reference (f32) mirroring the PyTorch module in eval mode
# ---------------------------------------------------------------------------
def _reference(hidden_ncw, input_ncw, conv_weight, conv_bias, gamma, beta,
               *, groups, eps=1e-12):
    n, cin, w_len = hidden_ncw.shape
    cout = input_ncw.shape[1]
    cig, cog = cin // groups, cout // groups
    outs = []
    for g in range(groups):
        xg = hidden_ncw[:, g * cig:(g + 1) * cig, :]         # (N, cig, W)
        wg = conv_weight[g * cog:(g + 1) * cog, :, 0]        # (cog, cig)
        outs.append(jnp.einsum("oi,niw->now", wg, xg,
                               precision=lax.Precision.HIGHEST))
    y = jnp.concatenate(outs, axis=1) + conv_bias[None, :, None]
    y = y + input_ncw
    mean = jnp.mean(y, axis=1, keepdims=True)
    var = jnp.mean((y - mean) ** 2, axis=1, keepdims=True)
    yn = (y - mean) / jnp.sqrt(var + eps)
    return yn * gamma[None, :, None] + beta[None, :, None]


# ---------------------------------------------------------------------------
# Demo / self-check
# ---------------------------------------------------------------------------
if __name__ == "__main__":

    def run_case(batch, cin, cout, groups, seq, dtype, tol):
        key = jax.random.PRNGKey(0)
        k1, k2, k3, k4, k5, k6 = jax.random.split(key, 6)
        hidden_states = jax.random.normal(k1, (batch, cin, seq), jnp.float32)
        input_tensor = jax.random.normal(k2, (batch, cout, seq), jnp.float32)

        # Parameter shapes per nn.Conv1d(cin, cout, 1, groups) / nn.LayerNorm(cout).
        fan_in = cin // groups
        bound = 1.0 / np.sqrt(fan_in)
        conv_weight = jax.random.uniform(k3, (cout, cin // groups, 1),
                                         jnp.float32, -bound, bound)
        conv_bias = jax.random.uniform(k4, (cout,), jnp.float32, -bound, bound)
        ln_gamma = 1.0 + 0.05 * jax.random.normal(k5, (cout,), jnp.float32)
        ln_beta = 0.05 * jax.random.normal(k6, (cout,), jnp.float32)

        hs = hidden_states.astype(dtype)
        it = input_tensor.astype(dtype)

        out = conv_dropout_layernorm(hs, it, conv_weight, conv_bias,
                                     ln_gamma, ln_beta, groups=groups,
                                     eps=1e-12)
        out = jax.block_until_ready(out)

        # Reference sees the same (rounded) operands the kernel streams.
        ref = _reference(hs.astype(jnp.float32), it.astype(jnp.float32),
                         conv_weight.astype(dtype).astype(jnp.float32),
                         conv_bias, ln_gamma, ln_beta, groups=groups,
                         eps=1e-12)
        # Tolerances cover MXU precision modes for the streamed dtype while
        # still catching any layout / grouping / LN-axis semantic error (O(1)).
        np.testing.assert_allclose(np.asarray(out, dtype=np.float32),
                                   np.asarray(ref), rtol=tol, atol=tol)

    # Lane-dense f32 config: grouped per-group-matmul path, 128-multiple W.
    run_case(batch=2, cin=128, cout=128, groups=4, seq=256,
             dtype=jnp.float32, tol=1e-2)
    # bf16 streaming config (halved HBM traffic; f32 accumulation inside).
    run_case(batch=2, cin=128, cout=128, groups=4, seq=384,
             dtype=jnp.bfloat16, tol=5e-2)
    # cin != cout (like the `output` ConvDropoutLayerNorm in the module).
    run_case(batch=2, cin=256, cout=128, groups=4, seq=128,
             dtype=jnp.float32, tol=1e-2)
    # Tiny config: W not 128-aligned -> full-W block fallback.
    run_case(batch=2, cin=32, cout=32, groups=4, seq=8,
             dtype=jnp.float32, tol=1e-2)
    # Non-sublane-aligned group size -> dense block-diagonal fallback path.
    run_case(batch=2, cin=24, cout=24, groups=2, seq=8,
             dtype=jnp.float32, tol=1e-2)

    print("KERNEL_OK")
</pallas_src>

<mosaic_0001>
module attributes {stable_mosaic.version = 11 : i64} {
  func.func @_conv_ln_kernel(%arg0: i32, %arg1: i32, %arg2: memref<1x128x256xf32, #tpu.memory_space<vmem>>, %arg3: memref<1x128x256xf32, #tpu.memory_space<vmem>>, %arg4: memref<4x32x32xf32, #tpu.memory_space<vmem>>, %arg5: memref<128x3xf32, #tpu.memory_space<vmem>>, %arg6: memref<1x128x256xf32, #tpu.memory_space<vmem>>, %arg7: memref<128x256xf32, #tpu.memory_space<vmem>>) attributes {dimension_semantics = [#tpu.dimension_semantics<parallel>, #tpu.dimension_semantics<parallel>], iteration_bounds = array<i64: 2, 1>, scalar_prefetch = 0 : i64, scratch_operands = 1 : i64, tpu.core_type = #tpu.core_type<tc>, window_params = [{transform_indices = @transform_0, window_bounds = array<i64: 1, 128, 256>}, {transform_indices = @transform_1, window_bounds = array<i64: 1, 128, 256>}, {pipeline_mode = #tpu.pipeline_mode<synchronous>, transform_indices = @transform_2, window_bounds = array<i64: 4, 32, 32>}, {pipeline_mode = #tpu.pipeline_mode<synchronous>, transform_indices = @transform_3, window_bounds = array<i64: 128, 3>}, {transform_indices = @transform_4, window_bounds = array<i64: 1, 128, 256>}]} {
    %c0 = arith.constant 0 : index
    %c0_0 = arith.constant 0 : index
    %0 = vector.load %arg5[%c0, %c0_0] : memref<128x3xf32, #tpu.memory_space<vmem>>, vector<128x3xf32>
    %1 = vector.extract_strided_slice %0 {offsets = [0, 0], sizes = [128, 1], strides = [1, 1]} : vector<128x3xf32> to vector<128x1xf32>
    %2 = vector.extract_strided_slice %0 {offsets = [0, 1], sizes = [128, 1], strides = [1, 1]} : vector<128x3xf32> to vector<128x1xf32>
    %3 = vector.extract_strided_slice %0 {offsets = [0, 2], sizes = [128, 1], strides = [1, 1]} : vector<128x3xf32> to vector<128x1xf32>
    %c0_1 = arith.constant 0 : index
    %c0_2 = arith.constant 0 : index
    %c0_3 = arith.constant 0 : index
    %4 = vector.load %arg2[%c0_1, %c0_2, %c0_3] : memref<1x128x256xf32, #tpu.memory_space<vmem>>, vector<1x128x256xf32>
    %5 = vector.shape_cast %4 : vector<1x128x256xf32> to vector<128x256xf32>
    %c0_4 = arith.constant 0 : index
    %c0_5 = arith.constant 0 : index
    %c0_6 = arith.constant 0 : index
    %6 = vector.load %arg3[%c0_4, %c0_5, %c0_6] : memref<1x128x256xf32, #tpu.memory_space<vmem>>, vector<1x128x256xf32>
    %7 = vector.shape_cast %6 : vector<1x128x256xf32> to vector<128x256xf32>
    %8 = vector.extract_strided_slice %5 {offsets = [0, 0], sizes = [32, 256], strides = [1, 1]} : vector<128x256xf32> to vector<32x256xf32>
    %c0_7 = arith.constant 0 : index
    %c0_8 = arith.constant 0 : index
    %c0_9 = arith.constant 0 : index
    %9 = vector.load %arg4[%c0_7, %c0_8, %c0_9] : memref<4x32x32xf32, #tpu.memory_space<vmem>>, vector<1x32x32xf32>
    %10 = vector.shape_cast %9 : vector<1x32x32xf32> to vector<32x32xf32>
    %cst = arith.constant dense<0.000000e+00> : vector<32x256xf32>
    %11 = tpu.matmul %10, %8, %cst {dimension_numbers = #tpu.dot_dimension_numbers<[1], [0], [0], [1], [0, 0, 1, 1], [], []>} : vector<32x32xf32>, vector<32x256xf32>, vector<32x256xf32> -> vector<32x256xf32>
    %12 = vector.extract_strided_slice %1 {offsets = [0, 0], sizes = [32, 1], strides = [1, 1]} : vector<128x1xf32> to vector<32x1xf32>
    %13 = vector.broadcast %12 : vector<32x1xf32> to vector<32x256xf32>
    %14 = arith.addf %11, %13 : vector<32x256xf32>
    %15 = vector.extract_strided_slice %7 {offsets = [0, 0], sizes = [32, 256], strides = [1, 1]} : vector<128x256xf32> to vector<32x256xf32>
    %16 = arith.addf %14, %15 : vector<32x256xf32>
    %c0_10 = arith.constant 0 : index
    %c0_11 = arith.constant 0 : index
    %17 = vector.load %arg7[%c0_10, %c0_11] : memref<128x256xf32, #tpu.memory_space<vmem>>, vector<32x256xf32>
    tpu.vector_store %arg7[%c0_10, %c0_11], %16 {strides = array<i32>} : memref<128x256xf32, #tpu.memory_space<vmem>>, vector<32x256xf32>,
    %18 = vector.extract_strided_slice %5 {offsets = [32, 0], sizes = [32, 256], strides = [1, 1]} : vector<128x256xf32> to vector<32x256xf32>
    %c1 = arith.constant 1 : index
    %c0_12 = arith.constant 0 : index
    %c0_13 = arith.constant 0 : index
    %19 = vector.load %arg4[%c1, %c0_12, %c0_13] : memref<4x32x32xf32, #tpu.memory_space<vmem>>, vector<1x32x32xf32>
    %20 = vector.shape_cast %19 : vector<1x32x32xf32> to vector<32x32xf32>
    %cst_14 = arith.constant dense<0.000000e+00> : vector<32x256xf32>
    %21 = tpu.matmul %20, %18, %cst_14 {dimension_numbers = #tpu.dot_dimension_numbers<[1], [0], [0], [1], [0, 0, 1, 1], [], []>} : vector<32x32xf32>, vector<32x256xf32>, vector<32x256xf32> -> vector<32x256xf32>
    %22 = vector.extract_strided_slice %1 {offsets = [32, 0], sizes = [32, 1], strides = [1, 1]} : vector<128x1xf32> to vector<32x1xf32>
    %23 = vector.broadcast %22 : vector<32x1xf32> to vector<32x256xf32>
    %24 = arith.addf %21, %23 : vector<32x256xf32>
    %25 = vector.extract_strided_slice %7 {offsets = [32, 0], sizes = [32, 256], strides = [1, 1]} : vector<128x256xf32> to vector<32x256xf32>
    %26 = arith.addf %24, %25 : vector<32x256xf32>
    %c32 = arith.constant 32 : index
    %c0_15 = arith.constant 0 : index
    %27 = vector.load %arg7[%c32, %c0_15] : memref<128x256xf32, #tpu.memory_space<vmem>>, vector<32x256xf32>
    tpu.vector_store %arg7[%c32, %c0_15], %26 {strides = array<i32>} : memref<128x256xf32, #tpu.memory_space<vmem>>, vector<32x256xf32>,
    %28 = vector.extract_strided_slice %5 {offsets = [64, 0], sizes = [32, 256], strides = [1, 1]} : vector<128x256xf32> to vector<32x256xf32>
    %c2 = arith.constant 2 : index
    %c0_16 = arith.constant 0 : index
    %c0_17 = arith.constant 0 : index
    %29 = vector.load %arg4[%c2, %c0_16, %c0_17] : memref<4x32x32xf32, #tpu.memory_space<vmem>>, vector<1x32x32xf32>
    %30 = vector.shape_cast %29 : vector<1x32x32xf32> to vector<32x32xf32>
    %cst_18 = arith.constant dense<0.000000e+00> : vector<32x256xf32>
    %31 = tpu.matmul %30, %28, %cst_18 {dimension_numbers = #tpu.dot_dimension_numbers<[1], [0], [0], [1], [0, 0, 1, 1], [], []>} : vector<32x32xf32>, vector<32x256xf32>, vector<32x256xf32> -> vector<32x256xf32>
    %32 = vector.extract_strided_slice %1 {offsets = [64, 0], sizes = [32, 1], strides = [1, 1]} : vector<128x1xf32> to vector<32x1xf32>
    %33 = vector.broadcast %32 : vector<32x1xf32> to vector<32x256xf32>
    %34 = arith.addf %31, %33 : vector<32x256xf32>
    %35 = vector.extract_strided_slice %7 {offsets = [64, 0], sizes = [32, 256], strides = [1, 1]} : vector<128x256xf32> to vector<32x256xf32>
    %36 = arith.addf %34, %35 : vector<32x256xf32>
    %c64 = arith.constant 64 : index
    %c0_19 = arith.constant 0 : index
    %37 = vector.load %arg7[%c64, %c0_19] : memref<128x256xf32, #tpu.memory_space<vmem>>, vector<32x256xf32>
    tpu.vector_store %arg7[%c64, %c0_19], %36 {strides = array<i32>} : memref<128x256xf32, #tpu.memory_space<vmem>>, vector<32x256xf32>,
    %38 = vector.extract_strided_slice %5 {offsets = [96, 0], sizes = [32, 256], strides = [1, 1]} : vector<128x256xf32> to vector<32x256xf32>
    %c3 = arith.constant 3 : index
    %c0_20 = arith.constant 0 : index
    %c0_21 = arith.constant 0 : index
    %39 = vector.load %arg4[%c3, %c0_20, %c0_21] : memref<4x32x32xf32, #tpu.memory_space<vmem>>, vector<1x32x32xf32>
    %40 = vector.shape_cast %39 : vector<1x32x32xf32> to vector<32x32xf32>
    %cst_22 = arith.constant dense<0.000000e+00> : vector<32x256xf32>
    %41 = tpu.matmul %40, %38, %cst_22 {dimension_numbers = #tpu.dot_dimension_numbers<[1], [0], [0], [1], [0, 0, 1, 1], [], []>} : vector<32x32xf32>, vector<32x256xf32>, vector<32x256xf32> -> vector<32x256xf32>
    %42 = vector.extract_strided_slice %1 {offsets = [96, 0], sizes = [32, 1], strides = [1, 1]} : vector<128x1xf32> to vector<32x1xf32>
    %43 = vector.broadcast %42 : vector<32x1xf32> to vector<32x256xf32>
    %44 = arith.addf %41, %43 : vector<32x256xf32>
    %45 = vector.extract_strided_slice %7 {offsets = [96, 0], sizes = [32, 256], strides = [1, 1]} : vector<128x256xf32> to vector<32x256xf32>
    %46 = arith.addf %44, %45 : vector<32x256xf32>
    %c96 = arith.constant 96 : index
    %c0_23 = arith.constant 0 : index
    %47 = vector.load %arg7[%c96, %c0_23] : memref<128x256xf32, #tpu.memory_space<vmem>>, vector<32x256xf32>
    tpu.vector_store %arg7[%c96, %c0_23], %46 {strides = array<i32>} : memref<128x256xf32, #tpu.memory_space<vmem>>, vector<32x256xf32>,
    %c0_24 = arith.constant 0 : index
    %c0_25 = arith.constant 0 : index
    %48 = vector.load %arg7[%c0_24, %c0_25] : memref<128x256xf32, #tpu.memory_space<vmem>>, vector<128x256xf32>
    %cst_26 = arith.constant dense<0.000000e+00> : vector<256xf32>
    %49 = vector.multi_reduction <add>, %48, %cst_26 [0] : vector<128x256xf32> to vector<256xf32>
    %50 = vector.shape_cast %49 : vector<256xf32> to vector<1x256xf32>
    %cst_27 = arith.constant 1.280000e+02 : f32
    %51 = vector.broadcast %cst_27 : f32 to vector<1x256xf32>
    %52 = arith.divf %50, %51 : vector<1x256xf32>
    %53 = vector.broadcast %52 : vector<1x256xf32> to vector<128x256xf32>
    %54 = arith.subf %48, %53 : vector<128x256xf32>
    %55 = arith.mulf %54, %54 : vector<128x256xf32>
    %cst_28 = arith.constant dense<0.000000e+00> : vector<256xf32>
    %56 = vector.multi_reduction <add>, %55, %cst_28 [0] : vector<128x256xf32> to vector<256xf32>
    %57 = vector.shape_cast %56 : vector<256xf32> to vector<1x256xf32>
    %cst_29 = arith.constant 1.280000e+02 : f32
    %58 = vector.broadcast %cst_29 : f32 to vector<1x256xf32>
    %59 = arith.divf %57, %58 : vector<1x256xf32>
    %cst_30 = arith.constant 9.99999996E-13 : f32
    %60 = vector.broadcast %cst_30 : f32 to vector<1x256xf32>
    %61 = arith.addf %59, %60 : vector<1x256xf32>
    %62 = math.rsqrt %61 : vector<1x256xf32>
    %63 = vector.broadcast %62 : vector<1x256xf32> to vector<128x256xf32>
    %64 = arith.mulf %54, %63 : vector<128x256xf32>
    %65 = vector.broadcast %2 : vector<128x1xf32> to vector<128x256xf32>
    %66 = arith.mulf %64, %65 : vector<128x256xf32>
    %67 = vector.broadcast %3 : vector<128x1xf32> to vector<128x256xf32>
    %68 = arith.addf %66, %67 : vector<128x256xf32>
    %c0_31 = arith.constant 0 : index
    %c0_32 = arith.constant 0 : index
    %c0_33 = arith.constant 0 : index
    %69 = vector.load %arg6[%c0_31, %c0_32, %c0_33] : memref<1x128x256xf32, #tpu.memory_space<vmem>>, vector<1x128x256xf32>
    %70 = vector.shape_cast %69 : vector<1x128x256xf32> to vector<128x256xf32>
    %71 = vector.shape_cast %68 : vector<128x256xf32> to vector<1x128x256xf32>
    tpu.vector_store %arg6[%c0_31, %c0_32, %c0_33], %71 {strides = array<i32>} : memref<1x128x256xf32, #tpu.memory_space<vmem>>, vector<1x128x256xf32>,
    return
  }
  func.func @transform_0(%arg0: i32, %arg1: i32) -> (i32, i32, i32) {
    %c0_i32 = arith.constant 0 : i32
    %c0_i32_0 = arith.constant 0 : i32
    return %arg0, %c0_i32, %arg1 : i32, i32, i32
  }
  func.func @transform_1(%arg0: i32, %arg1: i32) -> (i32, i32, i32) {
    %c0_i32 = arith.constant 0 : i32
    %c0_i32_0 = arith.constant 0 : i32
    return %arg0, %c0_i32, %arg1 : i32, i32, i32
  }
  func.func @transform_2(%arg0: i32, %arg1: i32) -> (i32, i32, i32) {
    %c0_i32 = arith.constant 0 : i32
    %c0_i32_0 = arith.constant 0 : i32
    %c0_i32_1 = arith.constant 0 : i32
    %c0_i32_2 = arith.constant 0 : i32
    return %c0_i32, %c0_i32_0, %c0_i32_1 : i32, i32, i32
  }
  func.func @transform_3(%arg0: i32, %arg1: i32) -> (i32, i32) {
    %c0_i32 = arith.constant 0 : i32
    %c0_i32_0 = arith.constant 0 : i32
    %c0_i32_1 = arith.constant 0 : i32
    return %c0_i32, %c0_i32_0 : i32, i32
  }
  func.func @transform_4(%arg0: i32, %arg1: i32) -> (i32, i32, i32) {
    %c0_i32 = arith.constant 0 : i32
    %c0_i32_0 = arith.constant 0 : i32
    return %arg0, %c0_i32, %arg1 : i32, i32, i32
  }
}

</mosaic_0001>

<bundles_post_ra>
// kernel: tpu_custom_call.1
= control target key start
LH: loop header
LB: loop body
LE: loop exit
PB: predicated region body
PF: predicated region fallthrough
CT: control target
= control target key end

     0   :  { %s2763_s0 = inlined_call_operand.hbm [shape: f32[2,128,256], index: 0, kind: input, shape index: {}]   ;;  %s2764_s1 = inlined_call_operand.hbm [shape: f32[2,128,256], index: 1, kind: input, shape index: {}]   ;;  %s2765_s2 = inlined_call_operand.vmem [shape: f32[4,32,32], index: 2, kind: input, shape index: {}]   ;;  %s2766_s3 = inlined_call_operand.vmem [shape: f32[128,3], index: 3, kind: input, shape index: {}]   ;;  %s2767_s4 = inlined_call_operand.hbm [shape: f32[2,128,256], index: 4, kind: output, shape index: {}]  }
   0x1   :  { %2772 = sst [smem:[#allocation16_spill]] %s2763_s0 }
   0x2   :  { %9 = vsyncpa [#allocation4], 0 }
   0x3   :  { %11 = vsyncpa [#allocation4 + $0x1], 0 }
   0x4   :  { %12 = vsyncpa [#allocation7], 0 }
   0x5   :  { %14 = vsyncpa [#allocation7 + $0x1], 0 }
   0x6   :  { %15 = vsyncpa [#allocation5], 0 }
   0x7   :  { %17 = vsyncpa [#allocation5 + $0x1], 0  ;;  %s1816_s15 = smov 0   ;;  %s1818_s16 = smov 0  }
   0x8   :  { %s1820_s17 = smov 0   ;;  %s1822_s18 = smov 0  }
   0x9   :  { %s1824_s19 = smov 0   ;;  %s1826_s20 = smov 0  }
   0xa LB: > { %s1503_s21 = sadd.s32 4294967295, %s1778_s20   ;;  %s1504_s22 = sadd.s32 4294967294, %s1778_s20   ;;  %s1778_s20 = sphi %s1826_s20, %s23_s20   ;;  %s1774_s19 = sphi %s1824_s19, %s2792_s19   ;;  %s1770_s18 = sphi %s1822_s18, %s2791_s18   ;;  %s1766_s17 = sphi %s1820_s17, %s2790_s17   ;;  %s1762_s16 = sphi %s1818_s16, %s2789_s16   ;;  %s1758_s15 = sphi %s1816_s15, %s2788_s15  }
   0xb   : > { %s35_s23 = sadd.s32 1, %s1774_s19  ;;  %s44_s24 = sadd.s32 1, %s1766_s17 }
   0xc   : > { %p37_p0 = scmp.ge.s32.totalorder %s35_s23, 2  ;;  %p51_p1 = scmp.ne.s32.totalorder %s1766_s17, %s1762_s16 }
   0xd   : > { %p52_p2 = scmp.eq.s32.totalorder %s1778_s20, 0  ;;  %p57_p3 = scmp.ne.s32.totalorder %s1762_s16, %s1758_s15 }
   0xe   : > { %s2794_s23 = smov (%p37_p0, %s35_s23), 0  ;;  %p58_p5 = scmp.eq.s32.totalorder %s1503_s21, 0 }
   0xf   : > { %2773 = sst [smem:[#allocation12_spill]] %s2794_s23  ;;  %p1857_p4 = por %p52_p2, %p51_p1 }
  0x10   : > { %s39_s26 = ssub.s32 %s1774_s19, %s2794_s23  ;;  %p153_p6 = scmp.eq.s32.totalorder %s1503_s21, 1 }
  0x11   : > { %p42_p7 = scmp.eq.s32.totalorder %s39_s26, 0  ;;  %p1863_p8 = por %p58_p5, %p57_p3 }
  0x12   : > { %p1867_p9 = por %p153_p6, %p51_p1  ;;  %p159_p10 = scmp.eq.s32.totalorder %s1504_s22, 1 }
  0x13   : > { %s1872_s29 = scalar_select %p42_p7, %s1766_s17, %s44_s24  }
  0x14   : > { %p1874_p11 = por %p159_p10, %p57_p3  ;;  %p1506_p12 = scmp.ge.s32.totalorder %s1778_s20, 2 }
  0x15   : > { %p1570_p13 = scmp.lt.s32.totalorder %s1778_s20, 2  ;;  %s1881_s5 = sand.u32 1, %s1766_s17  }
  0x16   : > { %s1507_s6 = sshll.u32 %s1881_s5, 8  ;;  %s1550_s7 = sshll.u32 %s1774_s19, 12 }
  0x17   : > { %s2778_s0 = sld [smem:[#allocation16_spill]]  ;;  %s189_s11 = scalar_lea.vmem [#allocation3], %s1507_s6 }
  0x18   : > { %s198_s12 = sshll.u32 %s189_s11, 4  ;;  %p1894_p0 = pnand %p1570_p13, %p1857_p4  ;;  %s199_s12 = int_to_ptr.vmem [resolvable:$true] %s198_s12 }
  0x19   : > { %p1513_p1 = scmp.ge.s32.totalorder %s1778_s20, 1  ;;  %s186_s14 = scalar_lea.sflag [#allocation4], %s1881_s5 }
  0x1a   : > { %p1640_p2 = pneg %p1894_p0  ;;  %s1651_s21 = scalar_lea.vmem %s199_s12, 4096 }
  0x1b   : > { %p1652_p3 = scmp.ne.s32.totalorder %s199_s12, %s1651_s21  ;;  %s1780_s22 = smov [#allocation3]  }
  0x1c   : > { %s1656_s24 = sshll.u32 %s1780_s22, 4  ;;  %s1657_s24 = int_to_ptr.vmem [resolvable:$false] %s1656_s24 }
  0x1d   : > { %s197_s10 = scalar_lea.hbm %s2778_s0, %s1550_s7  ;;  %p1654_p5 = pnand %p1652_p3, %p1640_p2 }
  0x1e   : > { %s1658_s25 = scalar_lea.vmem %s1657_s24, 8192  ;;  %p1659_p4 = scmp.lt.s32.totalorder %s199_s12, %s1657_s24 }
  0x1f   : > { %p1655_p6 = pneg %p1654_p5  ;;  %p1660_p7 = scmp.lt.s32.totalorder %s1658_s25, %s1651_s21 }
  0x21   : > { %p1661_p10 = por %p1660_p7, %p1659_p4 }
  0x23   : > { %p1662_p13 = pnand %p1661_p10, %p1655_p6 }
  0x25   : > { %1665 = shalt.err (!%p1662_p13)
}
  0x26   : > { %s1781_s26 = smov 256   ;;  %s1782_s8 = smov 16  }
  0x27   : > { %1562 = dma.hbm_to_vmem [thread:$0]  (!%p1894_p0), %s197_s10, 4096, %s199_s12, %s186_s14, %s1781_s26, %s1781_s26, %s1782_s8  }
  0x28   : > { %p229_p3 = scmp.lt.s32.totalorder %s1778_s20, 3  ;;  %s220_s21 = scalar_lea.hbm %s2764_s1, %s1550_s7 }
  0x29   : > { %s212_s24 = scalar_lea.vmem [#allocation6], %s1507_s6  ;;  %s209_s0 = scalar_lea.sflag [#allocation7], %s1881_s5 }
  0x2a   : > { %p1915_p5 = pnand %p1513_p1, %p229_p3  ;;  %s221_s25 = sshll.u32 %s212_s24, 4  ;;  %s222_s25 = int_to_ptr.vmem [resolvable:$true] %s221_s25 }
  0x2b   : > { %s1679_s23 = scalar_lea.vmem %s222_s25, 4096  ;;  %s1783_s10 = smov [#allocation6]  }
  0x2c   : > { %p1680_p6 = scmp.ne.s32.totalorder %s222_s25, %s1679_s23  ;;  %s1684_s12 = sshll.u32 %s1783_s10, 4  ;;  %s1685_s12 = int_to_ptr.vmem [resolvable:$false] %s1684_s12 }
  0x2d   : > { %s1686_s7 = scalar_lea.vmem %s1685_s12, 8192  ;;  %p1687_p10 = scmp.lt.s32.totalorder %s222_s25, %s1685_s12 }
  0x2e   : > { %p1682_p4 = pnand %p1680_p6, %p1640_p2  ;;  %p1688_p1 = scmp.lt.s32.totalorder %s1686_s7, %s1679_s23 }
  0x30   : > { %p1683_p7 = pneg %p1682_p4  ;;  %p1689_p13 = por %p1688_p1, %p1687_p10 }
  0x32   : > { %p1690_p3 = pnand %p1689_p13, %p1683_p7 }
  0x34   : > { %1693 = shalt.err (!%p1690_p3)
}
  0x35   : > { %1565 = dma.hbm_to_vmem [thread:$0]  (!%p1894_p0), %s220_s21, 4096, %s222_s25, %s209_s0, %s1781_s26, %s1781_s26, %s1782_s8  }
  0x36   : > { %233 = sbr.rel (%p1915_p5) target bundleno = 436 (0x1b4), region = 36 }
  0x3b   : > { %s1930_s5 = sand.u32 1, %s1762_s16  }
  0x3c   : > { %s1933_s6 = sshll.u32 %s1930_s5, 8  ;;  %s236_s14 = scalar_lea.sflag [#allocation4], %s1930_s5 }
  0x3d   : > { %s1937_s23 = scalar_lea.vmem [#allocation3], %s1933_s6 }
  0x3e   : > { %1745 = dma.done.wait (%p1863_p8), %s236_s14, 4096  }
  0x3f   : > { %1747 = vsyncadd (%p1863_p8), %s236_s14, 4294963200  ;;  %s245_s0 = scalar_lea.sflag [#allocation7], %s1930_s5  ;;  %s1945_s13 = scalar_lea.vmem [#allocation6], %s1933_s6 }
  0x40   : > { %1749 = dma.done.wait (%p1863_p8), %s245_s0, 4096  }
  0x41   : > { %1751 = vsyncadd (%p1863_p8), %s245_s0, 4294963200  ;;  %v1784_v0 = vmov 0.0   ;;  %v1785_v1 = vmov 0   ;;  %v304_v2 = vld [vmem:[%s1937_s23 + $0x38] sm:$0xff]  ;;  %v303_v4 = vld [vmem:[%s1937_s23 + $0x30] sm:$0xff]  ;;  %vm385_vm0 = vcmask 261120  }
  0x42   : > { %462 = vmatprep.mubr.f32.mxu0 %v1784_v0  ;;  %604 = vmatprep.mubr.f32.mxu1 %v1784_v0  ;;  %v312_v3 = vld [vmem:[%s1937_s23 + $0x78] sm:$0xff]  ;;  %v311_v5 = vld [vmem:[%s1937_s23 + $0x70] sm:$0xff]  ;;  %v302_v6 = vld [vmem:[%s1937_s23 + $0x28] sm:$0xff]  ;;  %s1788_s10 = smov [#allocation8]  }
  0x43   : > { %1628 = vset.pattern.permute.xlu0 %v1785_v1  ;;  %1629 = vset.pattern.permute.xlu1 %v1785_v1  ;;  %v310_v7 = vld [vmem:[%s1937_s23 + $0x68] sm:$0xff]  ;;  %v301_v8 = vld [vmem:[%s1937_s23 + $0x20] sm:$0xff]  ;;  %v300_v10 = vld [vmem:[%s1937_s23 + $0x18] sm:$0xff]  ;;  %s1698_s12 = sshll.u32 %s1788_s10, 4  ;;  %s1699_s12 = int_to_ptr.vmem [resolvable:$false] %s1698_s12 }
  0x44   : > { %422 = vmatprep.subr.mxu0 %v304_v2  ;;  %564 = vmatprep.subr.mxu1 %v312_v3  ;;  %v309_v9 = vld [vmem:[%s1937_s23 + $0x60] sm:$0xff]  ;;  %v308_v11 = vld [vmem:[%s1937_s23 + $0x58] sm:$0xff]  ;;  %v299_v12 = vld [vmem:[%s1937_s23 + $0x10] sm:$0xff]  ;;  %v1786_v2 = vmov 1   ;;  %v1787_v3 = vmov 2   ;;  %s1700_s7 = scalar_lea.vmem %s1699_s12, 8192 }
  0x45   : > { %423 = vmatpush1.msra.mxu0 %v303_v4  ;;  %565 = vmatpush1.msra.mxu1 %v311_v5  ;;  %v307_v13 = vld [vmem:[%s1937_s23 + $0x50] sm:$0xff]  ;;  %v298_v14 = vld [vmem:[%s1937_s23 + $0x8] sm:$0xff]  ;;  %v297_v16 = vld [vmem:[%s1937_s23] sm:$0xff] }
  0x46   : > { %424 = vmatprep.subr.mxu0 %v302_v6  ;;  %566 = vmatprep.subr.mxu1 %v310_v7  ;;  %v306_v15 = vld [vmem:[%s1937_s23 + $0x48] sm:$0xff]  ;;  %v305_v17 = vld [vmem:[%s1937_s23 + $0x40] sm:$0xff]  ;;  %v320_v20 = vld [vmem:[%s1937_s23 + $0xb8] sm:$0xff] }
  0x47   : > { %425 = vmatpush1.msra.mxu0 %v301_v8  ;;  %567 = vmatpush1.msra.mxu1 %v309_v9  ;;  %v361_v18 = vld [vmem:[%s2765_s2] sm:$0xff]  ;;  %v319_v21 = vld [vmem:[%s1937_s23 + $0xb0] sm:$0xff]  ;;  %v318_v22 = vld [vmem:[%s1937_s23 + $0xa8] sm:$0xff] }
  0x48   : > { %426 = vmatprep.subr.mxu0 %v300_v10  ;;  %568 = vmatprep.subr.mxu1 %v308_v11  ;;  %v1521_v19 = vld [vmem:[%s2765_s2 + $0x20] sm:$0xff]  ;;  %v328_v23 = vld [vmem:[%s1937_s23 + $0xf8] sm:$0xff]  ;;  %v362_v24 = vld [vmem:[%s2765_s2 + $0x8] sm:$0xff] }
  0x49   : > { %427 = vmatpush1.msra.mxu0 %v299_v12  ;;  %569 = vmatpush1.msra.mxu1 %v307_v13  ;;  %v1522_v25 = vld [vmem:[%s2765_s2 + $0x28] sm:$0xff]  ;;  %v317_v26 = vld [vmem:[%s1937_s23 + $0xa0] sm:$0xff]  ;;  %v316_v27 = vld [vmem:[%s1937_s23 + $0x98] sm:$0xff] }
  0x4a   : > { %428 = vmatprep.subr.mxu0 %v298_v14  ;;  %570 = vmatprep.subr.mxu1 %v306_v15  ;;  %v315_v28 = vld [vmem:[%s1937_s23 + $0x90] sm:$0xff]  ;;  %v326_v32 = vld [vmem:[%s1937_s23 + $0xe8] sm:$0xff]  ;;  %v325_v33 = vld [vmem:[%s1937_s23 + $0xe0] sm:$0xff] }
  0x4b   : > { %429 = vmatpush1.msra.mxu0 %v297_v16  ;;  %571 = vmatpush1.msra.mxu1 %v305_v17  ;;  %v327_v29 = vld [vmem:[%s1937_s23 + $0xf0] sm:$0xff]  ;;  %v314_v34 = vld [vmem:[%s1937_s23 + $0x88] sm:$0xff]  ;;  %v324_v35 = vld [vmem:[%s1937_s23 + $0xd8] sm:$0xff] }
  0x4c   : > { %1517 = vmatmul.mubr.msk.f32.vlgmr.msra.gmra.mxu0 %vm385_vm0, %v361_v18  ;;  %1525 = vmatmul.mubr.msk.f32.vlgmr.msra.gmra.mxu1 %vm385_vm0, %v1521_v19  ;;  %v363_v30 = vld [vmem:[%s2765_s2 + $0x10] sm:$0xff]  ;;  %v364_v36 = vld [vmem:[%s2765_s2 + $0x18] sm:$0xff]  ;;  %v313_v38 = vld [vmem:[%s1937_s23 + $0x80] sm:$0xff] }
  0x4d   : > { %706 = vmatprep.subr.mxu0 %v320_v20  ;;  %468 = vmatprep.mubr.f32.mxu0 %v1784_v0  ;;  %v1523_v31 = vld [vmem:[%s2765_s2 + $0x30] sm:$0xff]  ;;  %v1524_v37 = vld [vmem:[%s2765_s2 + $0x38] sm:$0xff]  ;;  %v322_v40 = vld [vmem:[%s1937_s23 + $0xc8] sm:$0xff] }
  0x4e   : > { %707 = vmatpush1.msra.mxu0 %v319_v21  ;;  %610 = vmatprep.mubr.f32.mxu1 %v1784_v0  ;;  %v323_v39 = vld [vmem:[%s1937_s23 + $0xd0] sm:$0xff]  ;;  %v321_v41 = vld [vmem:[%s1937_s23 + $0xc0] sm:$0xff]  ;;  %v1530_v46 = vld [vmem:[%s2765_s2 + $0x48] sm:$0xff]  ;;  %s1375_s23 = scalar_lea.sflag [#allocation5], %s1930_s5 }
  0x4f   : > { %708 = vmatprep.subr.mxu0 %v318_v22  ;;  %848 = vmatprep.subr.mxu1 %v328_v23  ;;  %v1529_v42 = vld [vmem:[%s2765_s2 + $0x40] sm:$0xff]  ;;  %v2039_v45 = vld [vmem:[%s2766_s3 + $0x10] sm:$0xff]  ;;  %v1538_v47 = vld [vmem:[%s2765_s2 + $0x68] sm:$0xff] }
  0x50   : > { %1518 = vmatmul.mubr.msk.f32.gmra.mxu0 %vm385_vm0, %v362_v24  ;;  %1526 = vmatmul.mubr.msk.f32.gmra.mxu1 %vm385_vm0, %v1522_v25  ;;  %v1537_v43 = vld [vmem:[%s2765_s2 + $0x60] sm:$0xff]  ;;  %v2056_v48 = vld [vmem:[%s2766_s3 + $0x8] sm:$0xff]  ;;  %v2061_v49 = vld [vmem:[%s2766_s3 + $0x18] sm:$0xff] }
  0x51   : > { %709 = vmatpush1.msra.mxu0 %v317_v26  ;;  %474 = vmatprep.mubr.f32.mxu0 %v1784_v0  ;;  %v2034_v44 = vld [vmem:[%s2766_s3] sm:$0xff]  ;;  %v1531_v50 = vld [vmem:[%s2765_s2 + $0x50] sm:$0xff]  ;;  %v286_v53 = vld [vmem:[%s2766_s3 + $0x28] sm:$0xff] }
  0x52   : > { %616 = vmatprep.mubr.f32.mxu1 %v1784_v0  ;;  %710 = vmatprep.subr.mxu0 %v316_v27  ;;  %v1539_v51 = vld [vmem:[%s2765_s2 + $0x70] sm:$0xff]  ;;  %v285_v52 = vld [vmem:[%s2766_s3 + $0x20] sm:$0xff]  ;;  %v1532_v54 = vld [vmem:[%s2765_s2 + $0x58] sm:$0xff] }
  0x53   : > { %711 = vmatpush1.msra.mxu0 %v315_v28  ;;  %849 = vmatpush1.msra.mxu1 %v327_v29  ;;  %v1540_v55 = vld [vmem:[%s2765_s2 + $0x78] sm:$0xff]  ;;  %v287_v56 = vld [vmem:[%s2766_s3 + $0x30] sm:$0xff]  ;;  %v289_v58 = vld [vmem:[%s2766_s3 + $0x40] sm:$0xff] }
  0x54   : > { %1519 = vmatmul.mubr.msk.f32.gmra.mxu0 %vm385_vm0, %v363_v30  ;;  %1527 = vmatmul.mubr.msk.f32.gmra.mxu1 %vm385_vm0, %v1523_v31  ;;  %v288_v57 = vld [vmem:[%s2766_s3 + $0x38] sm:$0xff]  ;;  %v290_v59 = vld [vmem:[%s2766_s3 + $0x48] sm:$0xff]  ;;  %v291_v60 = vld [vmem:[%s2766_s3 + $0x50] sm:$0xff] }
  0x55   : > { %850 = vmatprep.subr.mxu1 %v326_v32  ;;  %480 = vmatprep.mubr.f32.mxu0 %v1784_v0  ;;  %v292_v61 = vld [vmem:[%s2766_s3 + $0x58] sm:$0xff]  ;;  %v293_v62 = vld [vmem:[%s2766_s3 + $0x60] sm:$0xff]  ;;  %v294_v63 = vld [vmem:[%s2766_s3 + $0x68] sm:$0xff] }
  0x56   : > { %622 = vmatprep.mubr.f32.mxu1 %v1784_v0  ;;  %851 = vmatpush1.msra.mxu1 %v325_v33  ;;  %v296_v1 = vld [vmem:[%s2766_s3 + $0x78] sm:$0xff]  ;;  %v331_v17 = vld [vmem:[%s1945_s13 + $0x10] sm:$0xff]  ;;  %v329_v23 = vld [vmem:[%s1945_s13] sm:$0xff] }
  0x57   : > { %712 = vmatprep.subr.mxu0 %v314_v34  ;;  %852 = vmatprep.subr.mxu1 %v324_v35  ;;  %v332_v24 = vld [vmem:[%s1945_s13 + $0x18] sm:$0xff]  ;;  %v333_v25 = vld [vmem:[%s1945_s13 + $0x20] sm:$0xff]  ;;  %v330_v32 = vld [vmem:[%s1945_s13 + $0x8] sm:$0xff] }
  0x58   : > { %1520 = vmatmul.mubr.msk.f32.gmra.mxu0 %vm385_vm0, %v364_v36  ;;  %1528 = vmatmul.mubr.msk.f32.gmra.mxu1 %vm385_vm0, %v1524_v37  ;;  %v334_v33 = vld [vmem:[%s1945_s13 + $0x28] sm:$0xff] }
  0x59   : > { %713 = vmatpush1.msra.mxu0 %v313_v38  ;;  %853 = vmatpush1.msra.mxu1 %v323_v39 }
  0x5a   : > { %854 = vmatprep.subr.mxu1 %v322_v40  ;;  %746 = vmatprep.mubr.f32.mxu0 %v1784_v0 }
  0x5b   : > { %855 = vmatpush1.msra.mxu1 %v321_v41  ;;  %888 = vmatprep.mubr.f32.mxu1 %v1784_v0  ;;  %v335_v41 = vld [vmem:[%s1945_s13 + $0x30] sm:$0xff] }
  0x5c   : > { %1533 = vmatmul.mubr.msk.f32.vlgmr.msra.gmra.mxu0 %vm385_vm0, %v1529_v42  ;;  %1541 = vmatmul.mubr.msk.f32.vlgmr.msra.gmra.mxu1 %vm385_vm0, %v1537_v43 }
  0x5d   : > { %752 = vmatprep.mubr.f32.mxu0 %v1784_v0  ;;  %894 = vmatprep.mubr.f32.mxu1 %v1784_v0 }
  0x5e   : > { %367 = vperm.xlu0 %1628, %v2034_v44   ;;  %377 = vperm.xlu1 %1629, %v2039_v45  }
  0x60   : > { %1534 = vmatmul.mubr.msk.f32.gmra.mxu0 %vm385_vm0, %v1530_v46  ;;  %1542 = vmatmul.mubr.msk.f32.gmra.mxu1 %vm385_vm0, %v1538_v47 }
  0x61   : > { %758 = vmatprep.mubr.f32.mxu0 %v1784_v0  ;;  %900 = vmatprep.mubr.f32.mxu1 %v1784_v0 }
  0x62   : > { %372 = vperm.xlu0 %1628, %v2056_v48   ;;  %382 = vperm.xlu1 %1629, %v2061_v49  }
  0x64   : > { %1535 = vmatmul.mubr.msk.f32.gmra.mxu0 %vm385_vm0, %v1531_v50  ;;  %1543 = vmatmul.mubr.msk.f32.gmra.mxu1 %vm385_vm0, %v1539_v51 }
  0x65   : > { %764 = vmatprep.mubr.f32.mxu0 %v1784_v0  ;;  %906 = vmatprep.mubr.f32.mxu1 %v1784_v0  ;;  %v295_v0 = vld [vmem:[%s2766_s3 + $0x70] sm:$0xff] }
  0x66   : > { %510 = vperm.xlu0 %1628, %v285_v52   ;;  %515 = vperm.xlu1 %1629, %v286_v53  }
  0x68   : > { %1536 = vmatmul.mubr.msk.f32.gmra.mxu0 %vm385_vm0, %v1532_v54  ;;  %1544 = vmatmul.mubr.msk.f32.gmra.mxu1 %vm385_vm0, %v1540_v55 }
  0x6a   : > { %520 = vperm.xlu0 %1628, %v287_v56   ;;  %525 = vperm.xlu1 %1629, %v288_v57  }
  0x6e   : > { %652 = vperm.xlu0 %1628, %v289_v58   ;;  %657 = vperm.xlu1 %1629, %v290_v59  }
  0x72   : > { %662 = vperm.xlu0 %1628, %v291_v60   ;;  %667 = vperm.xlu1 %1629, %v292_v61  }
  0x76   : > { %794 = vperm.xlu0 %1628, %v293_v62   ;;  %799 = vperm.xlu1 %1629, %v294_v63  }
  0x7a   : > { %804 = vperm.xlu0 %1628, %v295_v0   ;;  %809 = vperm.xlu1 %1629, %v296_v1  }
  0x7e   : > { %1631 = vset.pattern.permute.xlu1 %v1786_v2  ;;  %1630 = vset.pattern.permute.xlu0 %v1786_v2  ;;  %v340_v2 = vld [vmem:[%s1945_s13 + $0x58] sm:$0xff] }
  0x7f   : > { %1155 = vperm.xlu1 %1631, %v2056_v48   ;;  %1151 = vperm.xlu0 %1630, %v2034_v44  }
  0x83   : > { %1159 = vperm.xlu1 %1631, %v2039_v45   ;;  %1163 = vperm.xlu0 %1630, %v2061_v49  }
  0x87   : > { %1167 = vperm.xlu1 %1631, %v285_v52   ;;  %1171 = vperm.xlu0 %1630, %v286_v53  }
  0x8b   : > { %1175 = vperm.xlu1 %1631, %v287_v56   ;;  %1179 = vperm.xlu0 %1630, %v288_v57  }
  0x8f   : > { %1183 = vperm.xlu1 %1631, %v289_v58   ;;  %1187 = vperm.xlu0 %1630, %v290_v59  }
  0x93   : > { %1191 = vperm.xlu1 %1631, %v291_v60   ;;  %1195 = vperm.xlu0 %1630, %v292_v61  }
  0x97   : > { %1199 = vperm.xlu1 %1631, %v293_v62   ;;  %1203 = vperm.xlu0 %1630, %v294_v63  }
  0x9b   : > { %1207 = vperm.xlu1 %1631, %v295_v0   ;;  %1211 = vperm.xlu0 %1630, %v296_v1  }
  0x9f   : > { %1632 = vset.pattern.permute.xlu1 %v1787_v3  ;;  %1633 = vset.pattern.permute.xlu0 %v1787_v3 }
  0xa0   : > { %1247 = vperm.xlu1 %1632, %v2034_v44   ;;  %1251 = vperm.xlu0 %1633, %v2056_v48  }
  0xa4   : > { %1255 = vperm.xlu1 %1632, %v2039_v45   ;;  %1263 = vperm.xlu0 %1633, %v285_v52   ;;  %v337_v45 = vld [vmem:[%s1945_s13 + $0x40] sm:$0xff]  ;;  %v336_v52 = vld [vmem:[%s1945_s13 + $0x38] sm:$0xff] }
  0xa8   : > { %1259 = vperm.xlu1 %1632, %v2061_v49   ;;  %1271 = vperm.xlu0 %1633, %v287_v56   ;;  %v338_v56 = vld [vmem:[%s1945_s13 + $0x48] sm:$0xff] }
  0xac   : > { %1267 = vperm.xlu1 %1632, %v286_v53   ;;  %1279 = vperm.xlu0 %1633, %v289_v58  }
  0xb0   : > { %1275 = vperm.xlu1 %1632, %v288_v57   ;;  %1287 = vperm.xlu0 %1633, %v291_v60  }
  0xb4   : > { %1283 = vperm.xlu1 %1632, %v290_v59   ;;  %1295 = vperm.xlu0 %1633, %v293_v62   ;;  %v339_v62 = vld [vmem:[%s1945_s13 + $0x50] sm:$0xff] }
  0xb8   : > { %1291 = vperm.xlu1 %1632, %v292_v61   ;;  %1303 = vperm.xlu0 %1633, %v295_v0  }
  0xbc   : > { %1299 = vperm.xlu1 %1632, %v294_v63  }
  0xc0   : > { %1307 = vperm.xlu1 %1632, %v296_v1  }
  0xd9   : > { %v368_v4 = vpop.permute.xlu0 %367  ;;  %v378_v5 = vpop.permute.xlu1 %377 }
  0xdd   : > { %v373_v6 = vpop.permute.xlu0 %372  ;;  %v383_v7 = vpop.permute.xlu1 %382 }
  0xe1   : > { %v511_v10 = vpop.permute.xlu0 %510  ;;  %v516_v13 = vpop.permute.xlu1 %515 }
  0xe5   : > { %v521_v20 = vpop.permute.xlu0 %520  ;;  %v526_v28 = vpop.permute.xlu1 %525 }
  0xe9   : > { %v653_v44 = vpop.permute.xlu0 %652  ;;  %v658_v55 = vpop.permute.xlu1 %657 }
 0x10c   : > { %v464_v8 = vpop.f32.mrf.mxu0  ;;  %v606_v9 = vpop.f32.mrf.mxu1 }
 0x10d   : > { %v465_v21 = vadd.f32 %v464_v8, %v368_v4  ;;  %v607_v40 = vadd.f32 %v606_v9, %v511_v10  ;;  %v341_v9 = vld [vmem:[%s1945_s13 + $0x60] sm:$0xff] }
 0x10e   : > { %v466_v11 = vpop.f32.mrf.mxu0  ;;  %v608_v12 = vpop.f32.mrf.mxu1 }
 0x10f   : > { %v467_v29 = vadd.f32 %v466_v11, %v368_v4  ;;  %v2139_v36 = vadd.f32 %v465_v21, %v329_v23  ;;  %v609_v50 = vadd.f32 %v608_v12, %v511_v10  ;;  %v2160_v61 = vadd.f32 %v607_v40, %v337_v45  ;;  %v663_v12 = vpop.permute.xlu0 %662  ;;  %v668_v23 = vpop.permute.xlu1 %667  ;;  %v347_v45 = vld [vmem:[%s1945_s13 + $0x90] sm:$0xff] }
 0x110   : > { %v470_v14 = vpop.f32.mrf.mxu0  ;;  %v612_v15 = vpop.f32.mrf.mxu1 }
 0x111   : > { %v471_v16 = vadd.f32 %v470_v14, %v373_v6  ;;  %v2147_v46 = vadd.f32 %v467_v29, %v330_v32  ;;  %v613_v51 = vadd.f32 %v612_v15, %v516_v13  ;;  %v2168_v8 = vadd.f32 %v609_v50, %v338_v56  ;;  %v342_v14 = vld [vmem:[%s1945_s13 + $0x68] sm:$0xff]  ;;  %v345_v32 = vld [vmem:[%s1945_s13 + $0x80] sm:$0xff] }
 0x112   : > { %v472_v18 = vpop.f32.mrf.mxu0  ;;  %v614_v19 = vpop.f32.mrf.mxu1 }
 0x113   : > { %v473_v22 = vadd.f32 %v472_v18, %v373_v6  ;;  %v2135_v30 = vadd.f32 %v471_v16, %v331_v17  ;;  %v615_v63 = vadd.f32 %v614_v19, %v516_v13  ;;  %v2171_v13 = vadd.f32 %v613_v51, %v339_v62  ;;  %v343_v19 = vld [vmem:[%s1945_s13 + $0x70] sm:$0xff] }
 0x114   : > { %v476_v26 = vpop.f32.mrf.mxu0  ;;  %v618_v27 = vpop.f32.mrf.mxu1 }
 0x115   : > { %v477_v31 = vadd.f32 %v476_v26, %v378_v5  ;;  %v2141_v37 = vadd.f32 %v473_v22, %v332_v24  ;;  %v961_v47 = vadd.f32 %v2135_v30, %v2139_v36  ;;  %v619_v3 = vadd.f32 %v618_v27, %v521_v20  ;;  %v344_v27 = vld [vmem:[%s1945_s13 + $0x78] sm:$0xff] }
 0x116   : > { %v478_v34 = vpop.f32.mrf.mxu0  ;;  %v620_v35 = vpop.f32.mrf.mxu1  ;;  %v2176_v18 = vadd.f32 %v615_v63, %v340_v2  ;;  %v350_v2 = vld [vmem:[%s1945_s13 + $0xa8] sm:$0xff] }
 0x117   : > { %v2143_v38 = vadd.f32 %v477_v31, %v333_v25  ;;  %v479_v39 = vadd.f32 %v478_v34, %v378_v5  ;;  %v982_v57 = vadd.f32 %v2141_v37, %v2147_v46  ;;  %v2179_v24 = vadd.f32 %v619_v3, %v341_v9 }
 0x118   : > { %v482_v42 = vpop.f32.mrf.mxu0  ;;  %v624_v43 = vpop.f32.mrf.mxu1 }
 0x119   : > { %v2151_v48 = vadd.f32 %v479_v39, %v334_v33  ;;  %v483_v49 = vadd.f32 %v482_v42, %v383_v7  ;;  %v962_v58 = vadd.f32 %v961_v47, %v2143_v38  ;;  %v625_v16 = vadd.f32 %v624_v43, %v526_v28 }
 0x11a   : > { %v484_v53 = vpop.f32.mrf.mxu0  ;;  %v626_v54 = vpop.f32.mrf.mxu1 }
 0x11b   : > { %v2158_v59 = vadd.f32 %v483_v49, %v335_v41  ;;  %v485_v60 = vadd.f32 %v484_v53, %v383_v7  ;;  %v983_v4 = vadd.f32 %v982_v57, %v2151_v48  ;;  %v621_v7 = vadd.f32 %v620_v35, %v521_v20  ;;  %v346_v41 = vld [vmem:[%s1945_s13 + $0x88] sm:$0xff] }
 0x11c   : > { %v748_v0 = vpop.f32.mrf.mxu0  ;;  %v890_v1 = vpop.f32.mrf.mxu1  ;;  %v627_v21 = vadd.f32 %v626_v54, %v526_v28  ;;  %v2187_v35 = vadd.f32 %v625_v16, %v343_v19  ;;  %v348_v54 = vld [vmem:[%s1945_s13 + $0x98] sm:$0xff] }
 0x11d   : > { %v963_v5 = vadd.f32 %v962_v58, %v2158_v59  ;;  %v2166_v6 = vadd.f32 %v485_v60, %v336_v52  ;;  %v749_v29 = vadd.f32 %v748_v0, %v653_v44  ;;  %v2184_v31 = vadd.f32 %v621_v7, %v342_v14  ;;  %v349_v58 = vld [vmem:[%s1945_s13 + $0xa0] sm:$0xff]  ;;  %v351_v7 = vld [vmem:[%s1945_s13 + $0xb0] sm:$0xff] }
 0x11e   : > { %v750_v10 = vpop.f32.mrf.mxu0  ;;  %v892_v11 = vpop.f32.mrf.mxu1  ;;  %v2192_v43 = vadd.f32 %v627_v21, %v344_v27  ;;  %v353_v14 = vld [vmem:[%s1945_s13 + $0xc0] sm:$0xff]  ;;  %v354_v27 = vld [vmem:[%s1945_s13 + $0xc8] sm:$0xff] }
 0x11f   : > { %v964_v15 = vadd.f32 %v963_v5, %v2160_v61  ;;  %v984_v17 = vadd.f32 %v983_v4, %v2166_v6  ;;  %v751_v33 = vadd.f32 %v750_v10, %v653_v44  ;;  %v795_v44 = vpop.permute.xlu0 %794  ;;  %v2197_v53 = vadd.f32 %v749_v29, %v345_v32  ;;  %v800_v4 = vpop.permute.xlu1 %799  ;;  %v355_v29 = vld [vmem:[%s1945_s13 + $0xd0] sm:$0xff] }
 0x120   : > { %v754_v22 = vpop.f32.mrf.mxu0  ;;  %v896_v20 = vpop.f32.mrf.mxu1  ;;  %v891_v5 = vadd.f32 %v890_v1, %v795_v44  ;;  %v893_v21 = vadd.f32 %v892_v11, %v795_v44  ;;  %v352_v1 = vld [vmem:[%s1945_s13 + $0xb8] sm:$0xff] }
 0x121   : > { %v965_v25 = vadd.f32 %v964_v15, %v2171_v13  ;;  %v985_v26 = vadd.f32 %v984_v17, %v2168_v8  ;;  %v755_v42 = vadd.f32 %v754_v22, %v658_v55  ;;  %v2200_v57 = vadd.f32 %v751_v33, %v346_v41 }
 0x122   : > { %v756_v34 = vpop.f32.mrf.mxu0  ;;  %v898_v28 = vpop.f32.mrf.mxu1  ;;  %v897_v22 = vadd.f32 %v896_v20, %v800_v4  ;;  %v2225_v41 = vadd.f32 %v891_v5, %v353_v14  ;;  %v356_v20 = vld [vmem:[%s1945_s13 + $0xd8] sm:$0xff] }
 0x123   : > { %v966_v39 = vadd.f32 %v965_v25, %v2179_v24  ;;  %v986_v40 = vadd.f32 %v985_v26, %v2176_v18  ;;  %v757_v47 = vadd.f32 %v756_v34, %v658_v55  ;;  %v2205_v0 = vadd.f32 %v755_v42, %v347_v45  ;;  %v810_v44 = vpop.permute.xlu1 %809 }
 0x124   : > { %v760_v49 = vpop.f32.mrf.mxu0  ;;  %v902_v50 = vpop.f32.mrf.mxu1  ;;  %v899_v11 = vadd.f32 %v898_v28, %v800_v4 }
 0x125   : > { %v967_v51 = vadd.f32 %v966_v39, %v2187_v35  ;;  %v987_v52 = vadd.f32 %v986_v40, %v2184_v31  ;;  %v761_v56 = vadd.f32 %v760_v49, %v663_v12  ;;  %v2208_v9 = vadd.f32 %v757_v47, %v348_v54  ;;  %v805_v40 = vpop.permute.xlu0 %804 }
 0x126   : > { %v762_v60 = vpop.f32.mrf.mxu0  ;;  %v904_v62 = vpop.f32.mrf.mxu1  ;;  %v903_v42 = vadd.f32 %v902_v50, %v805_v40 }
 0x127   : > { %v988_v55 = vadd.f32 %v987_v52, %v2192_v43  ;;  %v968_v63 = vadd.f32 %v967_v51, %v2197_v53  ;;  %v763_v3 = vadd.f32 %v762_v60, %v663_v12  ;;  %v2214_v17 = vadd.f32 %v761_v56, %v349_v58 }
 0x128   : > { %v766_v10 = vpop.f32.mrf.mxu0  ;;  %v908_v25 = vpop.f32.mrf.mxu1  ;;  %v2232_v51 = vadd.f32 %v893_v21, %v354_v27  ;;  %v2234_v52 = vadd.f32 %v897_v22, %v355_v29  ;;  %v905_v56 = vadd.f32 %v904_v62, %v805_v40  ;;  %v2239_v60 = vadd.f32 %v899_v11, %v356_v20 }
 0x129   : > { %v989_v15 = vadd.f32 %v988_v55, %v2200_v57  ;;  %v969_v16 = vadd.f32 %v968_v63, %v2205_v0  ;;  %v767_v19 = vadd.f32 %v766_v10, %v668_v23  ;;  %v2216_v12 = vadd.f32 %v763_v3, %v350_v2  ;;  %v358_v55 = vld [vmem:[%s1945_s13 + $0xe8] sm:$0xff]  ;;  %v359_v63 = vld [vmem:[%s1945_s13 + $0xf0] sm:$0xff] }
 0x12a   : > { %v768_v26 = vpop.f32.mrf.mxu0  ;;  %v910_v54 = vpop.f32.mrf.mxu1  ;;  %v909_v58 = vadd.f32 %v908_v25, %v810_v44  ;;  %v2248_v10 = vadd.f32 %v905_v56, %v358_v55 }
 0x12b   : > { %v990_v32 = vadd.f32 %v989_v15, %v2208_v9  ;;  %v970_v33 = vadd.f32 %v969_v16, %v2214_v17  ;;  %v2223_v34 = vadd.f32 %v767_v19, %v351_v7  ;;  %v769_v39 = vadd.f32 %v768_v26, %v668_v23  ;;  %v357_v23 = vld [vmem:[%s1945_s13 + $0xe0] sm:$0xff]  ;;  %v360_v7 = vld [vmem:[%s1945_s13 + $0xf8] sm:$0xff]  ;;  %s2632_s13 = scalar_lea.vmem [#allocation8], %s1933_s6  ;;  %s1552_s6 = sshll.u32 %s1770_s18, 12 }
 0x12c   : > { %v2243_v2 = vadd.f32 %v903_v42, %v357_v23  ;;  %v911_v5 = vadd.f32 %v910_v54, %v810_v44  ;;  %v2250_v62 = vadd.f32 %v909_v58, %v359_v63  ;;  %s1390_s21 = sshll.u32 %s2632_s13, 4  ;;  %s2697_s24 = scalar_lea.hbm %s2767_s4, %s1552_s6  ;;  %s2699_s21 = int_to_ptr.vmem [resolvable:$true] %s1390_s21 }
 0x12d   : > { %v991_v45 = vadd.f32 %v990_v32, %v2216_v12  ;;  %v971_v47 = vadd.f32 %v970_v33, %v2223_v34  ;;  %v2230_v49 = vadd.f32 %v769_v39, %v352_v1  ;;  %s1694_s25 = scalar_lea.vmem %s2699_s21, 4096  ;;  %p1701_p5 = scmp.lt.s32.totalorder %s2699_s21, %s1699_s12 }
 0x12e   : > { %v2255_v19 = vadd.f32 %v911_v5, %v360_v7  ;;  %p1695_p8 = scmp.ne.s32.totalorder %s2699_s21, %s1694_s25  ;;  %p1702_p6 = scmp.lt.s32.totalorder %s1700_s7, %s1694_s25 }
 0x12f   : > { %v972_v28 = vadd.f32 %v971_v47, %v2225_v41  ;;  %v992_v50 = vadd.f32 %v991_v45, %v2230_v49  ;;  %v2259_v45 = vpop.permute.xlu1 %1155 }
 0x130   : > { %p1696_p0 = pnand %p1695_p8, %p1867_p9  ;;  %p1703_p4 = por %p1702_p6, %p1701_p5 }
 0x131   : > { %v973_v3 = vadd.f32 %v972_v28, %v2234_v52  ;;  %v993_v4 = vadd.f32 %v992_v50, %v2232_v51 }
 0x132   : > { %p1697_p2 = pneg %p1696_p0 }
 0x133   : > { %v974_v14 = vadd.f32 %v973_v3, %v2243_v2  ;;  %v994_v15 = vadd.f32 %v993_v4, %v2239_v60  ;;  %v2265_v23 = vpop.permute.xlu1 %1159 }
 0x134   : > { %p1704_p7 = pnand %p1703_p4, %p1697_p2 }
 0x135   : > { %v975_v16 = vadd.f32 %v974_v14, %v2250_v62  ;;  %v995_v21 = vadd.f32 %v994_v15, %v2248_v10  ;;  %v2321_v15 = vpop.permute.xlu0 %1151 }
 0x137   : > { %v976_v22 = vrot.slane %v975_v16, 4  ;;  %v996_v25 = vadd.f32 %v995_v21, %v2255_v19  ;;  %v2299_v63 = vpop.permute.xlu1 %1167 }
 0x139   : > { %v977_v1 = vadd.f32 %v976_v22, %v975_v16  ;;  %v997_v26 = vrot.slane %v996_v25, 4 }
 0x13b   : > { %v978_v27 = vrot.slane %v977_v1, 2  ;;  %v998_v29 = vadd.f32 %v997_v26, %v996_v25 }
 0x13d   : > { %v979_v32 = vadd.f32 %v978_v27, %v977_v1  ;;  %v999_v33 = vrot.slane %v998_v29, 2  ;;  %v2343_v1 = vpop.permute.xlu1 %1175 }
 0x13f   : > { %v1000_v39 = vadd.f32 %v999_v33, %v998_v29  ;;  %v980_v40 = vrot.slane %v979_v32, 1 }
 0x141   : > { %v1001_v11 = vrot.slane %v1000_v39, 1  ;;  %v981_v20 = vadd.f32 %v980_v40, %v979_v32 }
 0x143   : > { %v1002_v42 = vadd.f32 %v1001_v11, %v1000_v39  ;;  %v2261_v47 = vmul.f32 0.0078125, %v981_v20  ;;  %v2361_v11 = vpop.permute.xlu0 %1163 }
 0x145   : > { %v2263_v44 = vmul.f32 0.0078125, %v1002_v42  ;;  %v2269_v54 = vsub.f32 %v2139_v36, %v2261_v47  ;;  %v2277_v28 = vsub.f32 %v2135_v30, %v2261_v47  ;;  %v2285_v50 = vsub.f32 %v2143_v38, %v2261_v47 }
 0x146   : > { %v2303_v38 = vsub.f32 %v2158_v59, %v2261_v47  ;;  %v2311_v3 = vsub.f32 %v2160_v61, %v2261_v47  ;;  %v2337_v25 = vsub.f32 %v2179_v24, %v2261_v47  ;;  %v2351_v32 = vsub.f32 %v2187_v35, %v2261_v47 }
 0x147   : > { %v2273_v56 = vsub.f32 %v2147_v46, %v2263_v44  ;;  %v2281_v58 = vsub.f32 %v2141_v37, %v2263_v44  ;;  %v2289_v36 = vsub.f32 %v2151_v48, %v2263_v44  ;;  %v1038_v46 = vmul.f32 %v2269_v54, %v2269_v54 }
 0x148   : > { %v1040_v30 = vmul.f32 %v2277_v28, %v2277_v28  ;;  %v2307_v48 = vsub.f32 %v2166_v6, %v2263_v44  ;;  %v2315_v4 = vsub.f32 %v2168_v8, %v2263_v44  ;;  %v1042_v5 = vmul.f32 %v2285_v50, %v2285_v50 }
 0x149   : > { %v1039_v55 = vmul.f32 %v2273_v56, %v2273_v56  ;;  %v1041_v37 = vmul.f32 %v2281_v58, %v2281_v58  ;;  %v1043_v7 = vmul.f32 %v2289_v36, %v2289_v36  ;;  %v2325_v6 = vsub.f32 %v2171_v13, %v2261_v47 }
 0x14a   : > { %v1070_v59 = vadd.f32 %v1040_v30, %v1038_v46  ;;  %v2329_v61 = vsub.f32 %v2176_v18, %v2263_v44  ;;  %v1044_v8 = vmul.f32 %v2303_v38, %v2303_v38  ;;  %v1045_v16 = vmul.f32 %v2307_v48, %v2307_v48 }
 0x14b   : > { %v1091_v14 = vadd.f32 %v1041_v37, %v1039_v55  ;;  %v2341_v13 = vsub.f32 %v2184_v31, %v2263_v44  ;;  %v1046_v18 = vmul.f32 %v2311_v3, %v2311_v3  ;;  %v1047_v26 = vmul.f32 %v2315_v4, %v2315_v4  ;;  %v2383_v37 = vpop.permute.xlu1 %1183 }
 0x14c   : > { %v1071_v21 = vadd.f32 %v1070_v59, %v1042_v5  ;;  %v2355_v24 = vsub.f32 %v2192_v43, %v2263_v44  ;;  %v1048_v31 = vmul.f32 %v2325_v6, %v2325_v6  ;;  %v1049_v33 = vmul.f32 %v2329_v61, %v2329_v61 }
 0x14d   : > { %v1092_v22 = vadd.f32 %v1091_v14, %v1043_v7  ;;  %v2365_v20 = vsub.f32 %v2197_v53, %v2261_v47  ;;  %v2369_v35 = vsub.f32 %v2200_v57, %v2263_v44  ;;  %v1050_v43 = vmul.f32 %v2337_v25, %v2337_v25 }
 0x14e   : > { %v1072_v27 = vadd.f32 %v1071_v21, %v1044_v8  ;;  %v1051_v42 = vmul.f32 %v2341_v13, %v2341_v13  ;;  %v2377_v30 = vsub.f32 %v2205_v0, %v2261_v47  ;;  %v2381_v53 = vsub.f32 %v2208_v9, %v2263_v44 }
 0x14f   : > { %v1093_v29 = vadd.f32 %v1092_v22, %v1045_v16  ;;  %v1052_v57 = vmul.f32 %v2351_v32, %v2351_v32  ;;  %v1053_v5 = vmul.f32 %v2355_v24, %v2355_v24  ;;  %v2391_v14 = vsub.f32 %v2214_v17, %v2261_v47  ;;  %v2401_v22 = vpop.permute.xlu0 %1171 }
 0x150   : > { %v1073_v39 = vadd.f32 %v1072_v27, %v1046_v18  ;;  %v2395_v0 = vsub.f32 %v2216_v12, %v2263_v44  ;;  %v1054_v9 = vmul.f32 %v2365_v20, %v2365_v20  ;;  %v1055_v8 = vmul.f32 %v2369_v35, %v2369_v35 }
 0x151   : > { %v1094_v40 = vadd.f32 %v1093_v29, %v1047_v26  ;;  %v2405_v18 = vsub.f32 %v2223_v34, %v2261_v47  ;;  %v2409_v17 = vsub.f32 %v2230_v49, %v2263_v44  ;;  %v1056_v12 = vmul.f32 %v2377_v30, %v2377_v30 }
 0x152   : > { %v1074_v46 = vadd.f32 %v1073_v39, %v1048_v31  ;;  %v1057_v26 = vmul.f32 %v2381_v53, %v2381_v53  ;;  %v2417_v31 = vsub.f32 %v2225_v41, %v2261_v47  ;;  %v2421_v34 = vsub.f32 %v2232_v51, %v2263_v44 }
 0x153   : > { %v1095_v55 = vadd.f32 %v1094_v40, %v1049_v33  ;;  %v2423_v33 = vpop.permute.xlu1 %1191  ;;  %v1058_v49 = vmul.f32 %v2391_v14, %v2391_v14  ;;  %v1059_v39 = vmul.f32 %v2395_v0, %v2395_v0  ;;  %v2435_v41 = vsub.f32 %v2239_v60, %v2263_v44 }
 0x154   : > { %v1075_v7 = vadd.f32 %v1074_v46, %v1050_v43  ;;  %v1060_v51 = vmul.f32 %v2405_v18, %v2405_v18  ;;  %v1061_v46 = vmul.f32 %v2409_v17, %v2409_v17  ;;  %v1062_v60 = vmul.f32 %v2417_v31, %v2417_v31 }
 0x155   : > { %v1096_v59 = vadd.f32 %v1095_v55, %v1051_v42  ;;  %v2431_v42 = vsub.f32 %v2234_v52, %v2261_v47  ;;  %2781 = vst [vmem:[#allocation13_spill] sm:$0xff] %v2435_v41  ;;  %v2449_v52 = vsub.f32 %v2248_v10, %v2263_v44 }
 0x156   : > { %v1076_v16 = vadd.f32 %v1075_v7, %v1052_v57  ;;  %v2445_v7 = vsub.f32 %v2243_v2, %v2261_v47  ;;  %v2461_v2 = vsub.f32 %v2255_v19, %v2263_v44 }
 0x157   : > { %v1097_v21 = vadd.f32 %v1096_v59, %v1053_v5  ;;  %v2441_v5 = vpop.permute.xlu0 %1179  ;;  %v1063_v59 = vmul.f32 %v2421_v34, %v2421_v34  ;;  %v1064_v10 = vmul.f32 %v2431_v42, %v2431_v42 }
 0x158   : > { %v1077_v27 = vadd.f32 %v1076_v16, %v1054_v9  ;;  %v2457_v16 = vsub.f32 %v2250_v62, %v2261_v47  ;;  %v1067_v62 = vmul.f32 %v2449_v52, %v2449_v52 }
 0x159   : > { %v1098_v29 = vadd.f32 %v1097_v21, %v1055_v8  ;;  %v2463_v21 = vpop.permute.xlu1 %1199 }
 0x15a   : > { %v1078_v40 = vadd.f32 %v1077_v27, %v1056_v12  ;;  %2782 = vst [vmem:[#allocation14_spill] sm:$0xff] %v2457_v16  ;;  %v1065_v12 = vmul.f32 %v2435_v41, %v2435_v41  ;;  %v1068_v44 = vmul.f32 %v2457_v16, %v2457_v16 }
 0x15b   : > { %v1099_v43 = vadd.f32 %v1098_v29, %v1057_v26  ;;  %v1066_v29 = vmul.f32 %v2445_v7, %v2445_v7  ;;  %v2473_v19 = vpop.permute.xlu0 %1187 }
 0x15c   : > { %v1079_v55 = vadd.f32 %v1078_v40, %v1058_v49 }
 0x15d   : > { %v1100_v57 = vadd.f32 %v1099_v43, %v1059_v39  ;;  %v1069_v39 = vmul.f32 %v2461_v2, %v2461_v2 }
 0x15e   : > { %v1080_v9 = vadd.f32 %v1079_v55, %v1060_v51  ;;  %v2479_v51 = vpop.permute.xlu1 %1207 }
 0x15f   : > { %v1101_v8 = vadd.f32 %v1100_v57, %v1061_v46 }
 0x160   : > { %v1081_v26 = vadd.f32 %v1080_v9, %v1062_v60 }
 0x161   : > { %v1102_v27 = vadd.f32 %v1101_v8, %v1063_v59  ;;  %v2481_v59 = vpop.permute.xlu0 %1195 }
 0x162   : > { %v1082_v47 = vadd.f32 %v1081_v26, %v1064_v10  ;;  %v2483_v10 = vpop.permute.xlu1 %1247 }
 0x163   : > { %v1103_v49 = vadd.f32 %v1102_v27, %v1065_v12 }
 0x164   : > { %v1083_v40 = vadd.f32 %v1082_v47, %v1066_v29 }
 0x165   : > { %v1104_v43 = vadd.f32 %v1103_v49, %v1067_v62  ;;  %v2485_v41 = vpop.permute.xlu0 %1203 }
 0x166   : > { %v1084_v46 = vadd.f32 %v1083_v40, %v1068_v44  ;;  %v2487_v47 = vpop.permute.xlu1 %1255 }
 0x167   : > { %v1105_v55 = vadd.f32 %v1104_v43, %v1069_v39 }
 0x168   : > { %v1085_v57 = vrot.slane %v1084_v46, 4 }
 0x169   : > { %v1106_v60 = vrot.slane %v1105_v55, 4  ;;  %v2489_v43 = vpop.permute.xlu0 %1211 }
 0x16a   : > { %v1086_v9 = vadd.f32 %v1085_v57, %v1084_v46  ;;  %v2491_v57 = vpop.permute.xlu1 %1259 }
 0x16b   : > { %v1107_v8 = vadd.f32 %v1106_v60, %v1105_v55 }
 0x16c   : > { %v1087_v12 = vrot.slane %v1086_v9, 2 }
 0x16d   : > { %v1108_v26 = vrot.slane %v1107_v8, 2  ;;  %v2493_v60 = vpop.permute.xlu0 %1251 }
 0x16e   : > { %v1088_v27 = vadd.f32 %v1087_v12, %v1086_v9  ;;  %v2495_v9 = vpop.permute.xlu1 %1267 }
 0x16f   : > { %v1109_v16 = vadd.f32 %v1108_v26, %v1107_v8 }
 0x170   : > { %v1089_v29 = vrot.slane %v1088_v27, 1 }
 0x171   : > { %v1110_v62 = vrot.slane %v1109_v16, 1  ;;  %v2497_v8 = vpop.permute.xlu0 %1263 }
 0x172   : > { %v1090_v49 = vadd.f32 %v1089_v29, %v1088_v27  ;;  %v2499_v12 = vpop.permute.xlu1 %1275 }
 0x173   : > { %v1111_v44 = vadd.f32 %v1110_v62, %v1109_v16 }
 0x174   : > { %v1112_v39 = vmul.f32 0.0078125, %v1090_v49 }
 0x175   : > { %v1113_v40 = vmul.f32 0.0078125, %v1111_v44  ;;  %v2501_v26 = vpop.permute.xlu0 %1271 }
 0x176   : > { %v1114_v46 = vadd.f32 1e-12, %v1112_v39  ;;  %2783 = vst [vmem:[#allocation15_spill] sm:$0xff] %v2501_v26  ;;  %v2539_v26 = vpop.permute.xlu1 %1283 }
 0x177   : > { %v1115_v55 = vadd.f32 1e-12, %v1113_v40 }
 0x178   : > { %1634 = vrsqrt.f32 %v1114_v46 }
 0x179   : > { %1636 = vrsqrt.f32 %v1115_v55 }
 0x185   : > { %v2503_v16 = vpop.eup %1634 }
 0x186   : > { %v2505_v27 = vpop.eup %1636  ;;  %v1120_v29 = vmul.f32 %v2503_v16, %v2277_v28  ;;  %v1122_v62 = vmul.f32 %v2503_v16, %v2285_v50  ;;  %v1126_v49 = vmul.f32 %v2503_v16, %v2311_v3  ;;  %v1118_v44 = vmul.f32 %v2503_v16, %v2269_v54 }
 0x187   : > { %v1121_v39 = vmul.f32 %v2505_v27, %v2281_v58  ;;  %v1123_v40 = vmul.f32 %v2505_v27, %v2289_v36  ;;  %v1127_v46 = vmul.f32 %v2505_v27, %v2315_v4  ;;  %v1119_v28 = vmul.f32 %v2505_v27, %v2273_v56 }
 0x188   : > { %v2524_v50 = vmul.f32 %v2259_v45, %v1120_v29  ;;  %v1218_v3 = vmul.f32 %v2265_v23, %v1122_v62  ;;  %v2528_v55 = vmul.f32 %v2299_v63, %v1126_v49  ;;  %v1214_v54 = vmul.f32 %v2321_v15, %v1118_v44 }
 0x189   : > { %v2532_v58 = vmul.f32 %v2259_v45, %v1121_v39  ;;  %v1219_v36 = vmul.f32 %v2265_v23, %v1123_v40  ;;  %v2536_v4 = vmul.f32 %v2299_v63, %v1127_v46  ;;  %v1215_v56 = vmul.f32 %v2321_v15, %v1119_v28  ;;  %v2549_v23 = vpop.permute.xlu0 %1279 }
 0x18a   : > { %v1130_v29 = vmul.f32 %v2503_v16, %v2337_v25  ;;  %v1131_v62 = vmul.f32 %v2505_v27, %v2341_v13  ;;  %v1124_v49 = vmul.f32 %v2503_v16, %v2303_v38  ;;  %v1125_v45 = vmul.f32 %v2505_v27, %v2307_v48 }
 0x18b   : > { %v1134_v63 = vmul.f32 %v2503_v16, %v2365_v20  ;;  %v1135_v15 = vmul.f32 %v2505_v27, %v2369_v35  ;;  %v1128_v25 = vmul.f32 %v2503_v16, %v2325_v6  ;;  %v1129_v13 = vmul.f32 %v2505_v27, %v2329_v61 }
 0x18c   : > { %v2560_v44 = vmul.f32 %v2343_v1, %v1130_v29  ;;  %v2563_v38 = vmul.f32 %v2343_v1, %v1131_v62  ;;  %v1220_v48 = vmul.f32 %v2361_v11, %v1124_v49  ;;  %v1221_v39 = vmul.f32 %v2361_v11, %v1125_v45  ;;  %v1292_v29 = vpop.permute.xlu1 %1291 }
 0x18d   : > { %v2568_v20 = vmul.f32 %v2383_v37, %v1134_v63  ;;  %v2571_v35 = vmul.f32 %v2383_v37, %v1135_v15  ;;  %v1224_v6 = vmul.f32 %v2401_v22, %v1128_v25  ;;  %v1225_v61 = vmul.f32 %v2401_v22, %v1129_v13  ;;  %v2599_v62 = vpop.permute.xlu0 %1287 }
 0x18e   : > { %v1138_v40 = vmul.f32 %v2503_v16, %v2391_v14  ;;  %v1139_v1 = vmul.f32 %v2505_v27, %v2395_v0  ;;  %v1132_v46 = vmul.f32 %v2503_v16, %v2351_v32  ;;  %v1133_v11 = vmul.f32 %v2505_v27, %v2355_v24 }
 0x18f   : > { %v1142_v37 = vmul.f32 %v2503_v16, %v2417_v31  ;;  %v1143_v28 = vmul.f32 %v2505_v27, %v2421_v34  ;;  %v1136_v22 = vmul.f32 %v2503_v16, %v2377_v30  ;;  %v1137_v14 = vmul.f32 %v2505_v27, %v2381_v53 }
 0x190   : > { %v2592_v0 = vmul.f32 %v2423_v33, %v1138_v40  ;;  %v2595_v32 = vmul.f32 %v2423_v33, %v1139_v1  ;;  %v1228_v24 = vmul.f32 %v2441_v5, %v1132_v46  ;;  %v1229_v31 = vmul.f32 %v2441_v5, %v1133_v11 }
 0x191   : > { %v2602_v34 = vmul.f32 %v2463_v21, %v1142_v37  ;;  %v2605_v30 = vmul.f32 %v2463_v21, %v1143_v28  ;;  %v1232_v53 = vmul.f32 %v2473_v19, %v1136_v22  ;;  %v1233_v49 = vmul.f32 %v2473_v19, %v1137_v14  ;;  %v2784_v19 = vld [vmem:[#allocation13_spill] sm:$0xff] }
 0x192   : > { %v1146_v33 = vmul.f32 %v2503_v16, %v2445_v7  ;;  %v1147_v45 = vmul.f32 %v2505_v27, %v2449_v52  ;;  %v1140_v5 = vmul.f32 %v2503_v16, %v2405_v18  ;;  %v1141_v63 = vmul.f32 %v2505_v27, %v2409_v17 }
 0x193   : > { %v1310_v15 = vadd.f32 %v2483_v10, %v1214_v54  ;;  %v1311_v21 = vadd.f32 %v2483_v10, %v1215_v56  ;;  %v1144_v25 = vmul.f32 %v2503_v16, %v2431_v42  ;;  %v1145_v13 = vmul.f32 %v2505_v27, %v2784_v19  ;;  %v1300_v56 = vpop.permute.xlu1 %1299 }
 0x194   : > { %v2624_v7 = vmul.f32 %v2479_v51, %v1146_v33  ;;  %v2627_v52 = vmul.f32 %v2479_v51, %v1147_v45  ;;  %v1236_v18 = vmul.f32 %v2481_v59, %v1140_v5  ;;  %v1237_v17 = vmul.f32 %v2481_v59, %v1141_v63  ;;  %v2785_v59 = vld [vmem:[#allocation14_spill] sm:$0xff] }
 0x195   : > { %1342 = vst [vmem:[%s2632_s13] sm:$0xff] %v1310_v15  ;;  %1343 = vst [vmem:[%s2632_s13 + $0x8] sm:$0xff] %v1311_v21  ;;  %v1240_v42 = vmul.f32 %v2485_v41, %v1144_v25  ;;  %v1241_v10 = vmul.f32 %v2485_v41, %v1145_v13  ;;  %v1314_v54 = vadd.f32 %v2487_v47, %v1218_v3  ;;  %v1296_v41 = vpop.permute.xlu0 %1295 }
 0x196   : > { %v1315_v51 = vadd.f32 %v2487_v47, %v1219_v36  ;;  %v1148_v40 = vmul.f32 %v2503_v16, %v2785_v59  ;;  %v1149_v1 = vmul.f32 %v2505_v27, %v2461_v2  ;;  %v1316_v46 = vadd.f32 %v2491_v57, %v1220_v48 }
 0x197   : > { %v1317_v11 = vadd.f32 %v2491_v57, %v1221_v39  ;;  %1346 = vst [vmem:[%s2632_s13 + $0x20] sm:$0xff] %v1314_v54  ;;  %v1320_v47 = vadd.f32 %v2495_v9, %v1224_v6  ;;  %v1321_v3 = vadd.f32 %v2495_v9, %v1225_v61  ;;  %v1324_v16 = vadd.f32 %v2499_v12, %v1228_v24  ;;  %v2786_v39 = vld [vmem:[#allocation15_spill] sm:$0xff] }
 0x198   : > { %1347 = vst [vmem:[%s2632_s13 + $0x28] sm:$0xff] %v1315_v51  ;;  %v1325_v2 = vadd.f32 %v2499_v12, %v1229_v31  ;;  %v1244_v27 = vmul.f32 %v2489_v43, %v1148_v40  ;;  %v1245_v57 = vmul.f32 %v2489_v43, %v1149_v1  ;;  %1348 = vst [vmem:[%s2632_s13 + $0x30] sm:$0xff] %v1316_v46 }
 0x199   : > { %1349 = vst [vmem:[%s2632_s13 + $0x38] sm:$0xff] %v1317_v11  ;;  %v1312_v36 = vadd.f32 %v2493_v60, %v2524_v50  ;;  %v1313_v9 = vadd.f32 %v2493_v60, %v2532_v58  ;;  %1352 = vst [vmem:[%s2632_s13 + $0x50] sm:$0xff] %v1320_v47  ;;  %v1328_v12 = vadd.f32 %v2539_v26, %v1232_v53 }
 0x19a   : > { %1353 = vst [vmem:[%s2632_s13 + $0x58] sm:$0xff] %v1321_v3  ;;  %1356 = vst [vmem:[%s2632_s13 + $0x70] sm:$0xff] %v1324_v16  ;;  %v1329_v43 = vadd.f32 %v2539_v26, %v1233_v49  ;;  %v1318_v48 = vadd.f32 %v2497_v8, %v2528_v55  ;;  %v1319_v50 = vadd.f32 %v2497_v8, %v2536_v4 }
 0x19b   : > { %1357 = vst [vmem:[%s2632_s13 + $0x78] sm:$0xff] %v1325_v2  ;;  %1344 = vst [vmem:[%s2632_s13 + $0x10] sm:$0xff] %v1312_v36  ;;  %v1332_v60 = vadd.f32 %v1292_v29, %v1236_v18  ;;  %v1333_v58 = vadd.f32 %v1292_v29, %v1237_v17  ;;  %v1322_v6 = vadd.f32 %v2786_v39, %v2560_v44  ;;  %v1308_v44 = vpop.permute.xlu1 %1307 }
 0x19c   : > { %1345 = vst [vmem:[%s2632_s13 + $0x18] sm:$0xff] %v1313_v9  ;;  %v1323_v26 = vadd.f32 %v2786_v39, %v2563_v38  ;;  %1360 = vst [vmem:[%s2632_s13 + $0x90] sm:$0xff] %v1328_v12  ;;  %v1336_v8 = vadd.f32 %v1300_v56, %v1240_v42  ;;  %v1337_v55 = vadd.f32 %v1300_v56, %v1241_v10 }
 0x19d   : > { %1361 = vst [vmem:[%s2632_s13 + $0x98] sm:$0xff] %v1329_v43  ;;  %1350 = vst [vmem:[%s2632_s13 + $0x40] sm:$0xff] %v1318_v48  ;;  %v1326_v4 = vadd.f32 %v2549_v23, %v2568_v20  ;;  %v1327_v61 = vadd.f32 %v2549_v23, %v2571_v35  ;;  %v1340_v38 = vadd.f32 %v1308_v44, %v1244_v27  ;;  %v1304_v23 = vpop.permute.xlu0 %1303 }
 0x19e   : > { %1351 = vst [vmem:[%s2632_s13 + $0x48] sm:$0xff] %v1319_v50  ;;  %1364 = vst [vmem:[%s2632_s13 + $0xb0] sm:$0xff] %v1332_v60  ;;  %v1341_v37 = vadd.f32 %v1308_v44, %v1245_v57  ;;  %v1330_v28 = vadd.f32 %v2599_v62, %v2592_v0  ;;  %v1331_v20 = vadd.f32 %v2599_v62, %v2595_v32 }
 0x19f   : > { %1365 = vst [vmem:[%s2632_s13 + $0xb8] sm:$0xff] %v1333_v58  ;;  %1354 = vst [vmem:[%s2632_s13 + $0x60] sm:$0xff] %v1322_v6  ;;  %v1334_v35 = vadd.f32 %v1296_v41, %v2602_v34  ;;  %v1335_v22 = vadd.f32 %v1296_v41, %v2605_v30  ;;  %v1338_v14 = vadd.f32 %v1304_v23, %v2624_v7 }
 0x1a0   : > { %1355 = vst [vmem:[%s2632_s13 + $0x68] sm:$0xff] %v1323_v26  ;;  %1368 = vst [vmem:[%s2632_s13 + $0xd0] sm:$0xff] %v1336_v8  ;;  %v1339_v29 = vadd.f32 %v1304_v23, %v2627_v52 }
 0x1a1   : > { %1369 = vst [vmem:[%s2632_s13 + $0xd8] sm:$0xff] %v1337_v55  ;;  %1358 = vst [vmem:[%s2632_s13 + $0x80] sm:$0xff] %v1326_v4 }
 0x1a2   : > { %1359 = vst [vmem:[%s2632_s13 + $0x88] sm:$0xff] %v1327_v61  ;;  %1372 = vst [vmem:[%s2632_s13 + $0xf0] sm:$0xff] %v1340_v38 }
 0x1a3   : > { %1373 = vst [vmem:[%s2632_s13 + $0xf8] sm:$0xff] %v1341_v37  ;;  %1362 = vst [vmem:[%s2632_s13 + $0xa0] sm:$0xff] %v1330_v28 }
 0x1a4   : > { %1363 = vst [vmem:[%s2632_s13 + $0xa8] sm:$0xff] %v1331_v20  ;;  %1366 = vst [vmem:[%s2632_s13 + $0xc0] sm:$0xff] %v1334_v35 }
 0x1a5   : > { %1367 = vst [vmem:[%s2632_s13 + $0xc8] sm:$0xff] %v1335_v22  ;;  %1370 = vst [vmem:[%s2632_s13 + $0xe0] sm:$0xff] %v1338_v14 }
 0x1a6   : > { %1371 = vst [vmem:[%s2632_s13 + $0xe8] sm:$0xff] %v1339_v29 }
 0x1a7   : > { %1707 = shalt.err (!%p1704_p7)
}
 0x1a8   : > { %s1708_s14 = scalar_lea.hbm %s2697_s24, 4096  ;;  %s1712_s26 = scalar_lea.hbm %s2767_s4, 8192 }
 0x1a9   : > { %p1709_p10 = scmp.ne.s32.totalorder %s2697_s24, %s1708_s14  ;;  %p1713_p3 = scmp.lt.s32.totalorder %s2697_s24, %s2767_s4 }
 0x1aa   : > { %p1714_p8 = scmp.lt.s32.totalorder %s1712_s26, %s1708_s14 }
 0x1ab   : > { %p1710_p1 = pnand %p1709_p10, %p1867_p9 }
 0x1ac   : > { %p1715_p0 = por %p1714_p8, %p1713_p3 }
 0x1ad   : > { %p1711_p13 = pneg %p1710_p1 }
 0x1af   : > { %p1716_p2 = pnand %p1715_p0, %p1711_p13 }
 0x1b1   : > { %1719 = shalt.err (!%p1716_p2)
}
 0x1b2   : > { %s1789_s11 = smov 256   ;;  %s1790_s13 = smov 16  }
 0x1b3   : > { %1557 = dma.vmem_to_hbm [thread:$0]  (%p1867_p9), %s2699_s21, 4096, %s2697_s24, %s1375_s23, %s1789_s11, %s1789_s11, %s1790_s13  }
 0x1b4 PF: > { %s1405_s6 = sand.u32 1, %s1758_s15   ;;  %p1567_p5 = pnand %p1506_p12, %p1874_p11 }
 0x1b5   : > { %s1406_s18 = scalar_lea.sflag [#allocation5], %s1405_s6 }
 0x1b6   : > { %p1568_p6 = pneg %p1567_p5 }
 0x1b8   : > { %1753 = dma.done.wait (%p1568_p6), %s1406_s18, 4096  }
 0x1b9   : > { %1755 = vsyncadd (%p1568_p6), %s1406_s18, 4294963200  ;;  %s23_s20 = sadd.s32 1, %s1778_s20   ;;  %s2787_s28 = sld [smem:[#allocation12_spill]] }
 0x1ba   : > { %p20_p4 = scmp.ge.s32.totalorder %s23_s20, 4   ;;  %s2788_s15 = smov %s1762_s16 }
 0x1bb   : > { %s2789_s16 = smov %s1766_s17  ;;  %s2790_s17 = smov %s1872_s29 }
 0x1bc   : > { %s2791_s18 = smov %s1774_s19  ;;  %22 = sbr.rel (!%p20_p4) target bundleno = 10 (0xa), region = 97 }
 0x1bf   : > { %s2792_s19 = smov %s2787_s28 }
 0x1c1   :  { %1411 = vsyncpa [#allocation4], 1 }
 0x1c2   :  { %1413 = vsyncpa [#allocation4 + $0x1], 1 }
 0x1c3   :  { %1414 = vsyncpa [#allocation7], 1 }
 0x1c4   :  { %1416 = vsyncpa [#allocation7 + $0x1], 1 }
 0x1c5   :  { %1417 = vsyncpa [#allocation5], 1 }
 0x1c6   :  { %1419 = vsyncpa [#allocation5 + $0x1], 1 }

</bundles_post_ra>
